<compile_context>
chip_gen: v7x
topology: tpu7x:2x2x1
jax: 0.10.0
libtpu: 0.0.40
codegen_flags: <defaults>
</compile_context>

<pallas_src>
import functools

import jax
import jax.numpy as jnp
from jax import lax
from jax.experimental import pallas as pl
from jax.experimental.pallas import tpu as pltpu


def _conv_kernel(x_ref, w_ref, b_ref, o_ref, xp_ref, *,
                 kh_sz, kw_sz, stride, pad, h_in, w_in, h_out, w_out,
                 wp, ld, s_total):
    """Whole (small) batch per grid step.

    x_ref : (NB, Cin, H*W)        lane-dense flattened input
    w_ref : (KH*KW, Cout, Cin)    per-tap weights
    b_ref : (Cout, 1)             bias
    o_ref : (NB, Cout, Hout*Wout) lane-dense flattened-NCHW output
    xp_ref: (NB, Cin, S)          VMEM scratch: reflection-padded image,
                                  flattened as Hp*Wp (+ a few slack lanes)
    """
    nb = x_ref.shape[0]
    c_in = x_ref.shape[1]
    c_out = o_ref.shape[1]
    hp = h_in + 2 * pad

    # ---- reflection padding: one in-register row build + ONE store per row --
    # The reflected source row is chosen statically (== nn.ReflectionPad2d),
    # so there is no H-reflection copy chain; the W reflection is concatenated
    # onto the interior row in-register and stored once.
    if pad > 0:
        xv = x_ref[...]                                        # (NB, Cin, H*W)
        for r in range(hp):
            i = r - pad
            sh = -i if i < 0 else (2 * (h_in - 1) - i if i >= h_in else i)
            interior = xv[:, :, sh * w_in:(sh + 1) * w_in]     # (NB, Cin, W)
            parts = ([interior[:, :, pad - j:pad - j + 1] for j in range(pad)]
                     + [interior]
                     + [interior[:, :, w_in - 2 - j:w_in - 1 - j]
                        for j in range(pad)])
            xp_ref[:, :, r * wp:(r + 1) * wp] = jnp.concatenate(parts, axis=-1)
        tail = s_total - hp * wp
        if tail > 0:
            # Zero the few slack lanes the last taps read past the image end
            # (they only ever feed garbage output columns that are never read).
            xp_ref[:, :, hp * wp:] = jnp.zeros((nb, c_in, tail), x_ref.dtype)

    bias = b_ref[...]                                          # (Cout, 1)

    # ---- KH*KW direct matmuls on the flat padded layout ----------------------
    # Tap (kh, kw) <-> contiguous lane slice at offset kh*Wp + kw: the whole
    # conv is a sum of shifted (Cout,Cin)@(Cin,L) matmuls, accumulated in f32.
    for n in range(nb):
        acc = jnp.zeros((c_out, ld), jnp.float32)
        for kh in range(kh_sz):
            for kw in range(kw_sz):
                shift = kh * wp + kw
                if pad > 0:
                    slab = xp_ref[n, :, shift:shift + ld]      # (Cin, L)
                else:                                          # pad==0 fast path
                    slab = x_ref[n, :, shift:shift + ld]
                w_tap = w_ref[kh * kw_sz + kw]                 # (Cout, Cin)
                acc = acc + jnp.dot(w_tap, slab,
                                    preferred_element_type=jnp.float32)
        acc = acc + bias

        # ---- epilogue: compact Wp-strided rows into a lane-dense output -----
        rows = []
        for oh in range(h_out):
            start = oh * stride * wp
            if stride == 1:
                rows.append(acc[:, start:start + w_out])
            else:
                rows.append(acc[:, start:start + (w_out - 1) * stride + 1:stride])
        out_val = jnp.concatenate(rows, axis=-1)               # (Cout, Hout*Wout)
        o_ref[n] = out_val.astype(o_ref.dtype)


def conv_layer_forward(x_nchw, weight_oihw, bias, *, stride):
    """Equivalent of ConvLayer.forward: ReflectionPad2d(k//2) + Conv2d(k, stride).

    x_nchw:      (N, Cin, H, W)
    weight_oihw: (Cout, Cin, KH, KW)   (PyTorch Conv2d layout)
    bias:        (Cout,)
    returns      (N, Cout, Hout, Wout)
    """
    n, c_in, h, w = x_nchw.shape
    c_out, c_in_w, kh_sz, kw_sz = weight_oihw.shape
    assert c_in == c_in_w
    assert kh_sz == kw_sz, "ConvLayer uses square kernels"
    pad = kh_sz // 2
    assert pad < h and pad < w, "reflection pad must be < spatial extent"
    if pad == 0:
        assert kh_sz == 1, "pad==0 fast path assumes a 1x1 kernel"

    hp, wp = h + 2 * pad, w + 2 * pad
    h_out = (hp - kh_sz) // stride + 1
    w_out = (wp - kw_sz) // stride + 1
    hw_out = h_out * w_out

    # Accumulation extent on the padded-width flat grid (dense stride-1 rows up
    # to the last one needed) and the padded-scratch lane count (with a few
    # slack lanes so every tap can read a full-length contiguous slab).
    ld = ((h_out - 1) * stride + 1) * wp
    s_total = max(hp * wp, (kh_sz - 1) * wp + (kw_sz - 1) + ld)

    # Lane-dense presentations: metadata-only reshape of the input, per-tap
    # weight layout, bias as a column.
    x_flat = x_nchw.reshape(n, c_in, h * w)
    w_taps = jnp.transpose(weight_oihw, (2, 3, 0, 1)).reshape(
        kh_sz * kw_sz, c_out, c_in)
    b2d = bias.reshape(c_out, 1)

    kernel = functools.partial(
        _conv_kernel,
        kh_sz=kh_sz, kw_sz=kw_sz, stride=stride, pad=pad,
        h_in=h, w_in=w, h_out=h_out, w_out=w_out,
        wp=wp, ld=ld, s_total=s_total)

    if pad > 0:
        scratch_shapes = [pltpu.VMEM((n, c_in, s_total), x_nchw.dtype)]
    else:
        scratch_shapes = [pltpu.VMEM((1, 1, 128), x_nchw.dtype)]   # unused

    out_flat = pl.pallas_call(
        kernel,
        out_shape=jax.ShapeDtypeStruct((n, c_out, hw_out), x_nchw.dtype),
        grid_spec=pltpu.PrefetchScalarGridSpec(
            num_scalar_prefetch=0,
            # Whole batch in a single grid step at these sizes (per-step
            # overhead otherwise dominates the ~100 KFLOP per-image work).
            grid=(1,),
            in_specs=[
                pl.BlockSpec((n, c_in, h * w), lambda b: (0, 0, 0)),
                pl.BlockSpec((kh_sz * kw_sz, c_out, c_in), lambda b: (0, 0, 0)),
                pl.BlockSpec((c_out, 1), lambda b: (0, 0)),
            ],
            out_specs=pl.BlockSpec((n, c_out, hw_out), lambda b: (0, 0, 0)),
            scratch_shapes=scratch_shapes,
        ),
        compiler_params=pltpu.CompilerParams(
            dimension_semantics=("parallel",)),
    )(x_flat, w_taps, b2d)

    # Free, metadata-only reshape: (N, Cout, Hout*Wout) -> (N, Cout, Hout, Wout)
    return out_flat.reshape(n, c_out, h_out, w_out)


def _reference_conv(x_nchw, weight_oihw, bias, *, stride):
    """Pure-JAX reference (reflect pad + lax.conv) for correctness checking."""
    pad = weight_oihw.shape[-1] // 2
    x_pad = jnp.pad(x_nchw, ((0, 0), (0, 0), (pad, pad), (pad, pad)),
                    mode="reflect")
    out = lax.conv_general_dilated(
        x_pad, weight_oihw, window_strides=(stride, stride), padding="VALID",
        dimension_numbers=("NCHW", "OIHW", "NCHW"),
        precision=lax.Precision.HIGHEST)
    return out + bias.reshape(1, -1, 1, 1)


if __name__ == "__main__":
    key = jax.random.PRNGKey(0)
    kx, kw1, kb1, kw2, kb2 = jax.random.split(key, 5)

    # Config 1: ResidualBlock-style ConvLayer (3x3, stride 1).
    N, C_IN, C_OUT, H, W, K, STRIDE = 2, 4, 8, 16, 16, 3, 1
    x = jax.random.normal(kx, (N, C_IN, H, W), dtype=jnp.float32)
    w1 = jax.random.normal(kw1, (C_OUT, C_IN, K, K), dtype=jnp.float32) * 0.1
    b1 = jax.random.normal(kb1, (C_OUT,), dtype=jnp.float32) * 0.1

    out1 = jax.block_until_ready(conv_layer_forward(x, w1, b1, stride=STRIDE))
    ref1 = _reference_conv(x, w1, b1, stride=STRIDE)
    assert out1.shape == (N, C_OUT, H, W), out1.shape
    assert jnp.allclose(out1, ref1, atol=1e-4, rtol=1e-4), (
        float(jnp.max(jnp.abs(out1 - ref1))))

    # Config 2: conv_input-style ConvLayer (11x11, stride 1, Cin=3 -> Cout=16).
    N2, C_IN2, C_OUT2, K2 = 1, 3, 16, 11
    x2 = jax.random.normal(kx, (N2, C_IN2, H, W), dtype=jnp.float32)
    w2 = jax.random.normal(kw2, (C_OUT2, C_IN2, K2, K2), dtype=jnp.float32) * 0.05
    b2 = jax.random.normal(kb2, (C_OUT2,), dtype=jnp.float32) * 0.05

    out2 = jax.block_until_ready(conv_layer_forward(x2, w2, b2, stride=1))
    ref2 = _reference_conv(x2, w2, b2, stride=1)
    assert out2.shape == (N2, C_OUT2, H, W), out2.shape
    assert jnp.allclose(out2, ref2, atol=1e-4, rtol=1e-4), (
        float(jnp.max(jnp.abs(out2 - ref2))))

    print("KERNEL_OK")
</pallas_src>

<mosaic_0001>
module attributes {stable_mosaic.version = 11 : i64} {
  func.func @_conv_kernel(%arg0: i32, %arg1: memref<2x4x256xf32, #tpu.memory_space<vmem>>, %arg2: memref<9x8x4xf32, #tpu.memory_space<vmem>>, %arg3: memref<8x1xf32, #tpu.memory_space<vmem>>, %arg4: memref<2x8x256xf32, #tpu.memory_space<vmem>>, %arg5: memref<2x4x326xf32, #tpu.memory_space<vmem>>) attributes {dimension_semantics = [#tpu.dimension_semantics<parallel>], iteration_bounds = array<i64: 1>, scalar_prefetch = 0 : i64, scratch_operands = 1 : i64, tpu.core_type = #tpu.core_type<tc>, window_params = [{pipeline_mode = #tpu.pipeline_mode<synchronous>, transform_indices = @transform_0, window_bounds = array<i64: 2, 4, 256>}, {pipeline_mode = #tpu.pipeline_mode<synchronous>, transform_indices = @transform_1, window_bounds = array<i64: 9, 8, 4>}, {pipeline_mode = #tpu.pipeline_mode<synchronous>, transform_indices = @transform_2, window_bounds = array<i64: 8, 1>}, {pipeline_mode = #tpu.pipeline_mode<synchronous>, transform_indices = @transform_3, window_bounds = array<i64: 2, 8, 256>}]} {
    %c0 = arith.constant 0 : index
    %c0_0 = arith.constant 0 : index
    %c0_1 = arith.constant 0 : index
    %0 = vector.load %arg1[%c0, %c0_0, %c0_1] : memref<2x4x256xf32, #tpu.memory_space<vmem>>, vector<2x4x256xf32>
    %1 = vector.extract_strided_slice %0 {offsets = [0, 0, 16], sizes = [2, 4, 16], strides = [1, 1, 1]} : vector<2x4x256xf32> to vector<2x4x16xf32>
    %2 = vector.extract_strided_slice %1 {offsets = [0, 0, 1], sizes = [2, 4, 1], strides = [1, 1, 1]} : vector<2x4x16xf32> to vector<2x4x1xf32>
    %3 = vector.extract_strided_slice %1 {offsets = [0, 0, 14], sizes = [2, 4, 1], strides = [1, 1, 1]} : vector<2x4x16xf32> to vector<2x4x1xf32>
    %4 = tpu.concatenate %2, %1, %3 in 2 : vector<2x4x1xf32>, vector<2x4x16xf32>, vector<2x4x1xf32> -> vector<2x4x18xf32>
    %c0_2 = arith.constant 0 : index
    %c0_3 = arith.constant 0 : index
    %c0_4 = arith.constant 0 : index
    %5 = vector.load %arg5[%c0_2, %c0_3, %c0_4] : memref<2x4x326xf32, #tpu.memory_space<vmem>>, vector<2x4x18xf32>
    tpu.vector_store %arg5[%c0_2, %c0_3, %c0_4], %4 {strides = array<i32>} : memref<2x4x326xf32, #tpu.memory_space<vmem>>, vector<2x4x18xf32>,
    %6 = vector.extract_strided_slice %0 {offsets = [0, 0, 0], sizes = [2, 4, 16], strides = [1, 1, 1]} : vector<2x4x256xf32> to vector<2x4x16xf32>
    %7 = vector.extract_strided_slice %6 {offsets = [0, 0, 1], sizes = [2, 4, 1], strides = [1, 1, 1]} : vector<2x4x16xf32> to vector<2x4x1xf32>
    %8 = vector.extract_strided_slice %6 {offsets = [0, 0, 14], sizes = [2, 4, 1], strides = [1, 1, 1]} : vector<2x4x16xf32> to vector<2x4x1xf32>
    %9 = tpu.concatenate %7, %6, %8 in 2 : vector<2x4x1xf32>, vector<2x4x16xf32>, vector<2x4x1xf32> -> vector<2x4x18xf32>
    %c0_5 = arith.constant 0 : index
    %c0_6 = arith.constant 0 : index
    %c18 = arith.constant 18 : index
    %10 = vector.load %arg5[%c0_5, %c0_6, %c18] : memref<2x4x326xf32, #tpu.memory_space<vmem>>, vector<2x4x18xf32>
    tpu.vector_store %arg5[%c0_5, %c0_6, %c18], %9 {strides = array<i32>} : memref<2x4x326xf32, #tpu.memory_space<vmem>>, vector<2x4x18xf32>,
    %11 = vector.extract_strided_slice %0 {offsets = [0, 0, 16], sizes = [2, 4, 16], strides = [1, 1, 1]} : vector<2x4x256xf32> to vector<2x4x16xf32>
    %12 = vector.extract_strided_slice %11 {offsets = [0, 0, 1], sizes = [2, 4, 1], strides = [1, 1, 1]} : vector<2x4x16xf32> to vector<2x4x1xf32>
    %13 = vector.extract_strided_slice %11 {offsets = [0, 0, 14], sizes = [2, 4, 1], strides = [1, 1, 1]} : vector<2x4x16xf32> to vector<2x4x1xf32>
    %14 = tpu.concatenate %12, %11, %13 in 2 : vector<2x4x1xf32>, vector<2x4x16xf32>, vector<2x4x1xf32> -> vector<2x4x18xf32>
    %c0_7 = arith.constant 0 : index
    %c0_8 = arith.constant 0 : index
    %c36 = arith.constant 36 : index
    %15 = vector.load %arg5[%c0_7, %c0_8, %c36] : memref<2x4x326xf32, #tpu.memory_space<vmem>>, vector<2x4x18xf32>
    tpu.vector_store %arg5[%c0_7, %c0_8, %c36], %14 {strides = array<i32>} : memref<2x4x326xf32, #tpu.memory_space<vmem>>, vector<2x4x18xf32>,
    %16 = vector.extract_strided_slice %0 {offsets = [0, 0, 32], sizes = [2, 4, 16], strides = [1, 1, 1]} : vector<2x4x256xf32> to vector<2x4x16xf32>
    %17 = vector.extract_strided_slice %16 {offsets = [0, 0, 1], sizes = [2, 4, 1], strides = [1, 1, 1]} : vector<2x4x16xf32> to vector<2x4x1xf32>
    %18 = vector.extract_strided_slice %16 {offsets = [0, 0, 14], sizes = [2, 4, 1], strides = [1, 1, 1]} : vector<2x4x16xf32> to vector<2x4x1xf32>
    %19 = tpu.concatenate %17, %16, %18 in 2 : vector<2x4x1xf32>, vector<2x4x16xf32>, vector<2x4x1xf32> -> vector<2x4x18xf32>
    %c0_9 = arith.constant 0 : index
    %c0_10 = arith.constant 0 : index
    %c54 = arith.constant 54 : index
    %20 = vector.load %arg5[%c0_9, %c0_10, %c54] : memref<2x4x326xf32, #tpu.memory_space<vmem>>, vector<2x4x18xf32>
    tpu.vector_store %arg5[%c0_9, %c0_10, %c54], %19 {strides = array<i32>} : memref<2x4x326xf32, #tpu.memory_space<vmem>>, vector<2x4x18xf32>,
    %21 = vector.extract_strided_slice %0 {offsets = [0, 0, 48], sizes = [2, 4, 16], strides = [1, 1, 1]} : vector<2x4x256xf32> to vector<2x4x16xf32>
    %22 = vector.extract_strided_slice %21 {offsets = [0, 0, 1], sizes = [2, 4, 1], strides = [1, 1, 1]} : vector<2x4x16xf32> to vector<2x4x1xf32>
    %23 = vector.extract_strided_slice %21 {offsets = [0, 0, 14], sizes = [2, 4, 1], strides = [1, 1, 1]} : vector<2x4x16xf32> to vector<2x4x1xf32>
    %24 = tpu.concatenate %22, %21, %23 in 2 : vector<2x4x1xf32>, vector<2x4x16xf32>, vector<2x4x1xf32> -> vector<2x4x18xf32>
    %c0_11 = arith.constant 0 : index
    %c0_12 = arith.constant 0 : index
    %c72 = arith.constant 72 : index
    %25 = vector.load %arg5[%c0_11, %c0_12, %c72] : memref<2x4x326xf32, #tpu.memory_space<vmem>>, vector<2x4x18xf32>
    tpu.vector_store %arg5[%c0_11, %c0_12, %c72], %24 {strides = array<i32>} : memref<2x4x326xf32, #tpu.memory_space<vmem>>, vector<2x4x18xf32>,
    %26 = vector.extract_strided_slice %0 {offsets = [0, 0, 64], sizes = [2, 4, 16], strides = [1, 1, 1]} : vector<2x4x256xf32> to vector<2x4x16xf32>
    %27 = vector.extract_strided_slice %26 {offsets = [0, 0, 1], sizes = [2, 4, 1], strides = [1, 1, 1]} : vector<2x4x16xf32> to vector<2x4x1xf32>
    %28 = vector.extract_strided_slice %26 {offsets = [0, 0, 14], sizes = [2, 4, 1], strides = [1, 1, 1]} : vector<2x4x16xf32> to vector<2x4x1xf32>
    %29 = tpu.concatenate %27, %26, %28 in 2 : vector<2x4x1xf32>, vector<2x4x16xf32>, vector<2x4x1xf32> -> vector<2x4x18xf32>
    %c0_13 = arith.constant 0 : index
    %c0_14 = arith.constant 0 : index
    %c90 = arith.constant 90 : index
    %30 = vector.load %arg5[%c0_13, %c0_14, %c90] : memref<2x4x326xf32, #tpu.memory_space<vmem>>, vector<2x4x18xf32>
    tpu.vector_store %arg5[%c0_13, %c0_14, %c90], %29 {strides = array<i32>} : memref<2x4x326xf32, #tpu.memory_space<vmem>>, vector<2x4x18xf32>,
    %31 = vector.extract_strided_slice %0 {offsets = [0, 0, 80], sizes = [2, 4, 16], strides = [1, 1, 1]} : vector<2x4x256xf32> to vector<2x4x16xf32>
    %32 = vector.extract_strided_slice %31 {offsets = [0, 0, 1], sizes = [2, 4, 1], strides = [1, 1, 1]} : vector<2x4x16xf32> to vector<2x4x1xf32>
    %33 = vector.extract_strided_slice %31 {offsets = [0, 0, 14], sizes = [2, 4, 1], strides = [1, 1, 1]} : vector<2x4x16xf32> to vector<2x4x1xf32>
    %34 = tpu.concatenate %32, %31, %33 in 2 : vector<2x4x1xf32>, vector<2x4x16xf32>, vector<2x4x1xf32> -> vector<2x4x18xf32>
    %c0_15 = arith.constant 0 : index
    %c0_16 = arith.constant 0 : index
    %c108 = arith.constant 108 : index
    %35 = vector.load %arg5[%c0_15, %c0_16, %c108] : memref<2x4x326xf32, #tpu.memory_space<vmem>>, vector<2x4x18xf32>
    tpu.vector_store %arg5[%c0_15, %c0_16, %c108], %34 {strides = array<i32>} : memref<2x4x326xf32, #tpu.memory_space<vmem>>, vector<2x4x18xf32>,
    %36 = vector.extract_strided_slice %0 {offsets = [0, 0, 96], sizes = [2, 4, 16], strides = [1, 1, 1]} : vector<2x4x256xf32> to vector<2x4x16xf32>
    %37 = vector.extract_strided_slice %36 {offsets = [0, 0, 1], sizes = [2, 4, 1], strides = [1, 1, 1]} : vector<2x4x16xf32> to vector<2x4x1xf32>
    %38 = vector.extract_strided_slice %36 {offsets = [0, 0, 14], sizes = [2, 4, 1], strides = [1, 1, 1]} : vector<2x4x16xf32> to vector<2x4x1xf32>
    %39 = tpu.concatenate %37, %36, %38 in 2 : vector<2x4x1xf32>, vector<2x4x16xf32>, vector<2x4x1xf32> -> vector<2x4x18xf32>
    %c0_17 = arith.constant 0 : index
    %c0_18 = arith.constant 0 : index
    %c126 = arith.constant 126 : index
    %40 = vector.load %arg5[%c0_17, %c0_18, %c126] : memref<2x4x326xf32, #tpu.memory_space<vmem>>, vector<2x4x18xf32>
    tpu.vector_store %arg5[%c0_17, %c0_18, %c126], %39 {strides = array<i32>} : memref<2x4x326xf32, #tpu.memory_space<vmem>>, vector<2x4x18xf32>,
    %41 = vector.extract_strided_slice %0 {offsets = [0, 0, 112], sizes = [2, 4, 16], strides = [1, 1, 1]} : vector<2x4x256xf32> to vector<2x4x16xf32>
    %42 = vector.extract_strided_slice %41 {offsets = [0, 0, 1], sizes = [2, 4, 1], strides = [1, 1, 1]} : vector<2x4x16xf32> to vector<2x4x1xf32>
    %43 = vector.extract_strided_slice %41 {offsets = [0, 0, 14], sizes = [2, 4, 1], strides = [1, 1, 1]} : vector<2x4x16xf32> to vector<2x4x1xf32>
    %44 = tpu.concatenate %42, %41, %43 in 2 : vector<2x4x1xf32>, vector<2x4x16xf32>, vector<2x4x1xf32> -> vector<2x4x18xf32>
    %c0_19 = arith.constant 0 : index
    %c0_20 = arith.constant 0 : index
    %c144 = arith.constant 144 : index
    %45 = vector.load %arg5[%c0_19, %c0_20, %c144] : memref<2x4x326xf32, #tpu.memory_space<vmem>>, vector<2x4x18xf32>
    tpu.vector_store %arg5[%c0_19, %c0_20, %c144], %44 {strides = array<i32>} : memref<2x4x326xf32, #tpu.memory_space<vmem>>, vector<2x4x18xf32>,
    %46 = vector.extract_strided_slice %0 {offsets = [0, 0, 128], sizes = [2, 4, 16], strides = [1, 1, 1]} : vector<2x4x256xf32> to vector<2x4x16xf32>
    %47 = vector.extract_strided_slice %46 {offsets = [0, 0, 1], sizes = [2, 4, 1], strides = [1, 1, 1]} : vector<2x4x16xf32> to vector<2x4x1xf32>
    %48 = vector.extract_strided_slice %46 {offsets = [0, 0, 14], sizes = [2, 4, 1], strides = [1, 1, 1]} : vector<2x4x16xf32> to vector<2x4x1xf32>
    %49 = tpu.concatenate %47, %46, %48 in 2 : vector<2x4x1xf32>, vector<2x4x16xf32>, vector<2x4x1xf32> -> vector<2x4x18xf32>
    %c0_21 = arith.constant 0 : index
    %c0_22 = arith.constant 0 : index
    %c162 = arith.constant 162 : index
    %50 = vector.load %arg5[%c0_21, %c0_22, %c162] : memref<2x4x326xf32, #tpu.memory_space<vmem>>, vector<2x4x18xf32>
    tpu.vector_store %arg5[%c0_21, %c0_22, %c162], %49 {strides = array<i32>} : memref<2x4x326xf32, #tpu.memory_space<vmem>>, vector<2x4x18xf32>,
    %51 = vector.extract_strided_slice %0 {offsets = [0, 0, 144], sizes = [2, 4, 16], strides = [1, 1, 1]} : vector<2x4x256xf32> to vector<2x4x16xf32>
    %52 = vector.extract_strided_slice %51 {offsets = [0, 0, 1], sizes = [2, 4, 1], strides = [1, 1, 1]} : vector<2x4x16xf32> to vector<2x4x1xf32>
    %53 = vector.extract_strided_slice %51 {offsets = [0, 0, 14], sizes = [2, 4, 1], strides = [1, 1, 1]} : vector<2x4x16xf32> to vector<2x4x1xf32>
    %54 = tpu.concatenate %52, %51, %53 in 2 : vector<2x4x1xf32>, vector<2x4x16xf32>, vector<2x4x1xf32> -> vector<2x4x18xf32>
    %c0_23 = arith.constant 0 : index
    %c0_24 = arith.constant 0 : index
    %c180 = arith.constant 180 : index
    %55 = vector.load %arg5[%c0_23, %c0_24, %c180] : memref<2x4x326xf32, #tpu.memory_space<vmem>>, vector<2x4x18xf32>
    tpu.vector_store %arg5[%c0_23, %c0_24, %c180], %54 {strides = array<i32>} : memref<2x4x326xf32, #tpu.memory_space<vmem>>, vector<2x4x18xf32>,
    %56 = vector.extract_strided_slice %0 {offsets = [0, 0, 160], sizes = [2, 4, 16], strides = [1, 1, 1]} : vector<2x4x256xf32> to vector<2x4x16xf32>
    %57 = vector.extract_strided_slice %56 {offsets = [0, 0, 1], sizes = [2, 4, 1], strides = [1, 1, 1]} : vector<2x4x16xf32> to vector<2x4x1xf32>
    %58 = vector.extract_strided_slice %56 {offsets = [0, 0, 14], sizes = [2, 4, 1], strides = [1, 1, 1]} : vector<2x4x16xf32> to vector<2x4x1xf32>
    %59 = tpu.concatenate %57, %56, %58 in 2 : vector<2x4x1xf32>, vector<2x4x16xf32>, vector<2x4x1xf32> -> vector<2x4x18xf32>
    %c0_25 = arith.constant 0 : index
    %c0_26 = arith.constant 0 : index
    %c198 = arith.constant 198 : index
    %60 = vector.load %arg5[%c0_25, %c0_26, %c198] : memref<2x4x326xf32, #tpu.memory_space<vmem>>, vector<2x4x18xf32>
    tpu.vector_store %arg5[%c0_25, %c0_26, %c198], %59 {strides = array<i32>} : memref<2x4x326xf32, #tpu.memory_space<vmem>>, vector<2x4x18xf32>,
    %61 = vector.extract_strided_slice %0 {offsets = [0, 0, 176], sizes = [2, 4, 16], strides = [1, 1, 1]} : vector<2x4x256xf32> to vector<2x4x16xf32>
    %62 = vector.extract_strided_slice %61 {offsets = [0, 0, 1], sizes = [2, 4, 1], strides = [1, 1, 1]} : vector<2x4x16xf32> to vector<2x4x1xf32>
    %63 = vector.extract_strided_slice %61 {offsets = [0, 0, 14], sizes = [2, 4, 1], strides = [1, 1, 1]} : vector<2x4x16xf32> to vector<2x4x1xf32>
    %64 = tpu.concatenate %62, %61, %63 in 2 : vector<2x4x1xf32>, vector<2x4x16xf32>, vector<2x4x1xf32> -> vector<2x4x18xf32>
    %c0_27 = arith.constant 0 : index
    %c0_28 = arith.constant 0 : index
    %c216 = arith.constant 216 : index
    %65 = vector.load %arg5[%c0_27, %c0_28, %c216] : memref<2x4x326xf32, #tpu.memory_space<vmem>>, vector<2x4x18xf32>
    tpu.vector_store %arg5[%c0_27, %c0_28, %c216], %64 {strides = array<i32>} : memref<2x4x326xf32, #tpu.memory_space<vmem>>, vector<2x4x18xf32>,
    %66 = vector.extract_strided_slice %0 {offsets = [0, 0, 192], sizes = [2, 4, 16], strides = [1, 1, 1]} : vector<2x4x256xf32> to vector<2x4x16xf32>
    %67 = vector.extract_strided_slice %66 {offsets = [0, 0, 1], sizes = [2, 4, 1], strides = [1, 1, 1]} : vector<2x4x16xf32> to vector<2x4x1xf32>
    %68 = vector.extract_strided_slice %66 {offsets = [0, 0, 14], sizes = [2, 4, 1], strides = [1, 1, 1]} : vector<2x4x16xf32> to vector<2x4x1xf32>
    %69 = tpu.concatenate %67, %66, %68 in 2 : vector<2x4x1xf32>, vector<2x4x16xf32>, vector<2x4x1xf32> -> vector<2x4x18xf32>
    %c0_29 = arith.constant 0 : index
    %c0_30 = arith.constant 0 : index
    %c234 = arith.constant 234 : index
    %70 = vector.load %arg5[%c0_29, %c0_30, %c234] : memref<2x4x326xf32, #tpu.memory_space<vmem>>, vector<2x4x18xf32>
    tpu.vector_store %arg5[%c0_29, %c0_30, %c234], %69 {strides = array<i32>} : memref<2x4x326xf32, #tpu.memory_space<vmem>>, vector<2x4x18xf32>,
    %71 = vector.extract_strided_slice %0 {offsets = [0, 0, 208], sizes = [2, 4, 16], strides = [1, 1, 1]} : vector<2x4x256xf32> to vector<2x4x16xf32>
    %72 = vector.extract_strided_slice %71 {offsets = [0, 0, 1], sizes = [2, 4, 1], strides = [1, 1, 1]} : vector<2x4x16xf32> to vector<2x4x1xf32>
    %73 = vector.extract_strided_slice %71 {offsets = [0, 0, 14], sizes = [2, 4, 1], strides = [1, 1, 1]} : vector<2x4x16xf32> to vector<2x4x1xf32>
    %74 = tpu.concatenate %72, %71, %73 in 2 : vector<2x4x1xf32>, vector<2x4x16xf32>, vector<2x4x1xf32> -> vector<2x4x18xf32>
    %c0_31 = arith.constant 0 : index
    %c0_32 = arith.constant 0 : index
    %c252 = arith.constant 252 : index
    %75 = vector.load %arg5[%c0_31, %c0_32, %c252] : memref<2x4x326xf32, #tpu.memory_space<vmem>>, vector<2x4x18xf32>
    tpu.vector_store %arg5[%c0_31, %c0_32, %c252], %74 {strides = array<i32>} : memref<2x4x326xf32, #tpu.memory_space<vmem>>, vector<2x4x18xf32>,
    %76 = vector.extract_strided_slice %0 {offsets = [0, 0, 224], sizes = [2, 4, 16], strides = [1, 1, 1]} : vector<2x4x256xf32> to vector<2x4x16xf32>
    %77 = vector.extract_strided_slice %76 {offsets = [0, 0, 1], sizes = [2, 4, 1], strides = [1, 1, 1]} : vector<2x4x16xf32> to vector<2x4x1xf32>
    %78 = vector.extract_strided_slice %76 {offsets = [0, 0, 14], sizes = [2, 4, 1], strides = [1, 1, 1]} : vector<2x4x16xf32> to vector<2x4x1xf32>
    %79 = tpu.concatenate %77, %76, %78 in 2 : vector<2x4x1xf32>, vector<2x4x16xf32>, vector<2x4x1xf32> -> vector<2x4x18xf32>
    %c0_33 = arith.constant 0 : index
    %c0_34 = arith.constant 0 : index
    %c270 = arith.constant 270 : index
    %80 = vector.load %arg5[%c0_33, %c0_34, %c270] : memref<2x4x326xf32, #tpu.memory_space<vmem>>, vector<2x4x18xf32>
    tpu.vector_store %arg5[%c0_33, %c0_34, %c270], %79 {strides = array<i32>} : memref<2x4x326xf32, #tpu.memory_space<vmem>>, vector<2x4x18xf32>,
    %81 = vector.extract_strided_slice %0 {offsets = [0, 0, 240], sizes = [2, 4, 16], strides = [1, 1, 1]} : vector<2x4x256xf32> to vector<2x4x16xf32>
    %82 = vector.extract_strided_slice %81 {offsets = [0, 0, 1], sizes = [2, 4, 1], strides = [1, 1, 1]} : vector<2x4x16xf32> to vector<2x4x1xf32>
    %83 = vector.extract_strided_slice %81 {offsets = [0, 0, 14], sizes = [2, 4, 1], strides = [1, 1, 1]} : vector<2x4x16xf32> to vector<2x4x1xf32>
    %84 = tpu.concatenate %82, %81, %83 in 2 : vector<2x4x1xf32>, vector<2x4x16xf32>, vector<2x4x1xf32> -> vector<2x4x18xf32>
    %c0_35 = arith.constant 0 : index
    %c0_36 = arith.constant 0 : index
    %c288 = arith.constant 288 : index
    %85 = vector.load %arg5[%c0_35, %c0_36, %c288] : memref<2x4x326xf32, #tpu.memory_space<vmem>>, vector<2x4x18xf32>
    tpu.vector_store %arg5[%c0_35, %c0_36, %c288], %84 {strides = array<i32>} : memref<2x4x326xf32, #tpu.memory_space<vmem>>, vector<2x4x18xf32>,
    %86 = vector.extract_strided_slice %0 {offsets = [0, 0, 224], sizes = [2, 4, 16], strides = [1, 1, 1]} : vector<2x4x256xf32> to vector<2x4x16xf32>
    %87 = vector.extract_strided_slice %86 {offsets = [0, 0, 1], sizes = [2, 4, 1], strides = [1, 1, 1]} : vector<2x4x16xf32> to vector<2x4x1xf32>
    %88 = vector.extract_strided_slice %86 {offsets = [0, 0, 14], sizes = [2, 4, 1], strides = [1, 1, 1]} : vector<2x4x16xf32> to vector<2x4x1xf32>
    %89 = tpu.concatenate %87, %86, %88 in 2 : vector<2x4x1xf32>, vector<2x4x16xf32>, vector<2x4x1xf32> -> vector<2x4x18xf32>
    %c0_37 = arith.constant 0 : index
    %c0_38 = arith.constant 0 : index
    %c306 = arith.constant 306 : index
    %90 = vector.load %arg5[%c0_37, %c0_38, %c306] : memref<2x4x326xf32, #tpu.memory_space<vmem>>, vector<2x4x18xf32>
    tpu.vector_store %arg5[%c0_37, %c0_38, %c306], %89 {strides = array<i32>} : memref<2x4x326xf32, #tpu.memory_space<vmem>>, vector<2x4x18xf32>,
    %cst = arith.constant 0.000000e+00 : f32
    %91 = vector.broadcast %cst : f32 to vector<2x4x2xf32>
    %c0_39 = arith.constant 0 : index
    %c0_40 = arith.constant 0 : index
    %c324 = arith.constant 324 : index
    %92 = vector.load %arg5[%c0_39, %c0_40, %c324] : memref<2x4x326xf32, #tpu.memory_space<vmem>>, vector<2x4x2xf32>
    tpu.vector_store %arg5[%c0_39, %c0_40, %c324], %91 {strides = array<i32>} : memref<2x4x326xf32, #tpu.memory_space<vmem>>, vector<2x4x2xf32>,
    %c0_41 = arith.constant 0 : index
    %c0_42 = arith.constant 0 : index
    %93 = vector.load %arg3[%c0_41, %c0_42] : memref<8x1xf32, #tpu.memory_space<vmem>>, vector<8x1xf32>
    %cst_43 = arith.constant 0.000000e+00 : f32
    %94 = vector.broadcast %cst_43 : f32 to vector<8x288xf32>
    %c0_44 = arith.constant 0 : index
    %c0_45 = arith.constant 0 : index
    %c0_46 = arith.constant 0 : index
    %95 = vector.load %arg5[%c0_44, %c0_45, %c0_46] : memref<2x4x326xf32, #tpu.memory_space<vmem>>, vector<1x4x288xf32>
    %96 = vector.shape_cast %95 : vector<1x4x288xf32> to vector<4x288xf32>
    %c0_47 = arith.constant 0 : index
    %c0_48 = arith.constant 0 : index
    %c0_49 = arith.constant 0 : index
    %97 = vector.load %arg2[%c0_47, %c0_48, %c0_49] : memref<9x8x4xf32, #tpu.memory_space<vmem>>, vector<1x8x4xf32>
    %98 = vector.shape_cast %97 : vector<1x8x4xf32> to vector<8x4xf32>
    %cst_50 = arith.constant dense<0.000000e+00> : vector<8x288xf32>
    %99 = tpu.matmul %98, %96, %cst_50 {dimension_numbers = #tpu.dot_dimension_numbers<[1], [0], [0], [1], [0, 0, 1, 1], [], []>} : vector<8x4xf32>, vector<4x288xf32>, vector<8x288xf32> -> vector<8x288xf32>
    %100 = arith.addf %94, %99 : vector<8x288xf32>
    %c0_51 = arith.constant 0 : index
    %c0_52 = arith.constant 0 : index
    %c1 = arith.constant 1 : index
    %101 = vector.load %arg5[%c0_51, %c0_52, %c1] : memref<2x4x326xf32, #tpu.memory_space<vmem>>, vector<1x4x288xf32>
    %102 = vector.shape_cast %101 : vector<1x4x288xf32> to vector<4x288xf32>
    %c1_53 = arith.constant 1 : index
    %c0_54 = arith.constant 0 : index
    %c0_55 = arith.constant 0 : index
    %103 = vector.load %arg2[%c1_53, %c0_54, %c0_55] : memref<9x8x4xf32, #tpu.memory_space<vmem>>, vector<1x8x4xf32>
    %104 = vector.shape_cast %103 : vector<1x8x4xf32> to vector<8x4xf32>
    %cst_56 = arith.constant dense<0.000000e+00> : vector<8x288xf32>
    %105 = tpu.matmul %104, %102, %cst_56 {dimension_numbers = #tpu.dot_dimension_numbers<[1], [0], [0], [1], [0, 0, 1, 1], [], []>} : vector<8x4xf32>, vector<4x288xf32>, vector<8x288xf32> -> vector<8x288xf32>
    %106 = arith.addf %100, %105 : vector<8x288xf32>
    %c0_57 = arith.constant 0 : index
    %c0_58 = arith.constant 0 : index
    %c2 = arith.constant 2 : index
    %107 = vector.load %arg5[%c0_57, %c0_58, %c2] : memref<2x4x326xf32, #tpu.memory_space<vmem>>, vector<1x4x288xf32>
    %108 = vector.shape_cast %107 : vector<1x4x288xf32> to vector<4x288xf32>
    %c2_59 = arith.constant 2 : index
    %c0_60 = arith.constant 0 : index
    %c0_61 = arith.constant 0 : index
    %109 = vector.load %arg2[%c2_59, %c0_60, %c0_61] : memref<9x8x4xf32, #tpu.memory_space<vmem>>, vector<1x8x4xf32>
    %110 = vector.shape_cast %109 : vector<1x8x4xf32> to vector<8x4xf32>
    %cst_62 = arith.constant dense<0.000000e+00> : vector<8x288xf32>
    %111 = tpu.matmul %110, %108, %cst_62 {dimension_numbers = #tpu.dot_dimension_numbers<[1], [0], [0], [1], [0, 0, 1, 1], [], []>} : vector<8x4xf32>, vector<4x288xf32>, vector<8x288xf32> -> vector<8x288xf32>
    %112 = arith.addf %106, %111 : vector<8x288xf32>
    %c0_63 = arith.constant 0 : index
    %c0_64 = arith.constant 0 : index
    %c18_65 = arith.constant 18 : index
    %113 = vector.load %arg5[%c0_63, %c0_64, %c18_65] : memref<2x4x326xf32, #tpu.memory_space<vmem>>, vector<1x4x288xf32>
    %114 = vector.shape_cast %113 : vector<1x4x288xf32> to vector<4x288xf32>
    %c3 = arith.constant 3 : index
    %c0_66 = arith.constant 0 : index
    %c0_67 = arith.constant 0 : index
    %115 = vector.load %arg2[%c3, %c0_66, %c0_67] : memref<9x8x4xf32, #tpu.memory_space<vmem>>, vector<1x8x4xf32>
    %116 = vector.shape_cast %115 : vector<1x8x4xf32> to vector<8x4xf32>
    %cst_68 = arith.constant dense<0.000000e+00> : vector<8x288xf32>
    %117 = tpu.matmul %116, %114, %cst_68 {dimension_numbers = #tpu.dot_dimension_numbers<[1], [0], [0], [1], [0, 0, 1, 1], [], []>} : vector<8x4xf32>, vector<4x288xf32>, vector<8x288xf32> -> vector<8x288xf32>
    %118 = arith.addf %112, %117 : vector<8x288xf32>
    %c0_69 = arith.constant 0 : index
    %c0_70 = arith.constant 0 : index
    %c19 = arith.constant 19 : index
    %119 = vector.load %arg5[%c0_69, %c0_70, %c19] : memref<2x4x326xf32, #tpu.memory_space<vmem>>, vector<1x4x288xf32>
    %120 = vector.shape_cast %119 : vector<1x4x288xf32> to vector<4x288xf32>
    %c4 = arith.constant 4 : index
    %c0_71 = arith.constant 0 : index
    %c0_72 = arith.constant 0 : index
    %121 = vector.load %arg2[%c4, %c0_71, %c0_72] : memref<9x8x4xf32, #tpu.memory_space<vmem>>, vector<1x8x4xf32>
    %122 = vector.shape_cast %121 : vector<1x8x4xf32> to vector<8x4xf32>
    %cst_73 = arith.constant dense<0.000000e+00> : vector<8x288xf32>
    %123 = tpu.matmul %122, %120, %cst_73 {dimension_numbers = #tpu.dot_dimension_numbers<[1], [0], [0], [1], [0, 0, 1, 1], [], []>} : vector<8x4xf32>, vector<4x288xf32>, vector<8x288xf32> -> vector<8x288xf32>
    %124 = arith.addf %118, %123 : vector<8x288xf32>
    %c0_74 = arith.constant 0 : index
    %c0_75 = arith.constant 0 : index
    %c20 = arith.constant 20 : index
    %125 = vector.load %arg5[%c0_74, %c0_75, %c20] : memref<2x4x326xf32, #tpu.memory_space<vmem>>, vector<1x4x288xf32>
    %126 = vector.shape_cast %125 : vector<1x4x288xf32> to vector<4x288xf32>
    %c5 = arith.constant 5 : index
    %c0_76 = arith.constant 0 : index
    %c0_77 = arith.constant 0 : index
    %127 = vector.load %arg2[%c5, %c0_76, %c0_77] : memref<9x8x4xf32, #tpu.memory_space<vmem>>, vector<1x8x4xf32>
    %128 = vector.shape_cast %127 : vector<1x8x4xf32> to vector<8x4xf32>
    %cst_78 = arith.constant dense<0.000000e+00> : vector<8x288xf32>
    %129 = tpu.matmul %128, %126, %cst_78 {dimension_numbers = #tpu.dot_dimension_numbers<[1], [0], [0], [1], [0, 0, 1, 1], [], []>} : vector<8x4xf32>, vector<4x288xf32>, vector<8x288xf32> -> vector<8x288xf32>
    %130 = arith.addf %124, %129 : vector<8x288xf32>
    %c0_79 = arith.constant 0 : index
    %c0_80 = arith.constant 0 : index
    %c36_81 = arith.constant 36 : index
    %131 = vector.load %arg5[%c0_79, %c0_80, %c36_81] : memref<2x4x326xf32, #tpu.memory_space<vmem>>, vector<1x4x288xf32>
    %132 = vector.shape_cast %131 : vector<1x4x288xf32> to vector<4x288xf32>
    %c6 = arith.constant 6 : index
    %c0_82 = arith.constant 0 : index
    %c0_83 = arith.constant 0 : index
    %133 = vector.load %arg2[%c6, %c0_82, %c0_83] : memref<9x8x4xf32, #tpu.memory_space<vmem>>, vector<1x8x4xf32>
    %134 = vector.shape_cast %133 : vector<1x8x4xf32> to vector<8x4xf32>
    %cst_84 = arith.constant dense<0.000000e+00> : vector<8x288xf32>
    %135 = tpu.matmul %134, %132, %cst_84 {dimension_numbers = #tpu.dot_dimension_numbers<[1], [0], [0], [1], [0, 0, 1, 1], [], []>} : vector<8x4xf32>, vector<4x288xf32>, vector<8x288xf32> -> vector<8x288xf32>
    %136 = arith.addf %130, %135 : vector<8x288xf32>
    %c0_85 = arith.constant 0 : index
    %c0_86 = arith.constant 0 : index
    %c37 = arith.constant 37 : index
    %137 = vector.load %arg5[%c0_85, %c0_86, %c37] : memref<2x4x326xf32, #tpu.memory_space<vmem>>, vector<1x4x288xf32>
    %138 = vector.shape_cast %137 : vector<1x4x288xf32> to vector<4x288xf32>
    %c7 = arith.constant 7 : index
    %c0_87 = arith.constant 0 : index
    %c0_88 = arith.constant 0 : index
    %139 = vector.load %arg2[%c7, %c0_87, %c0_88] : memref<9x8x4xf32, #tpu.memory_space<vmem>>, vector<1x8x4xf32>
    %140 = vector.shape_cast %139 : vector<1x8x4xf32> to vector<8x4xf32>
    %cst_89 = arith.constant dense<0.000000e+00> : vector<8x288xf32>
    %141 = tpu.matmul %140, %138, %cst_89 {dimension_numbers = #tpu.dot_dimension_numbers<[1], [0], [0], [1], [0, 0, 1, 1], [], []>} : vector<8x4xf32>, vector<4x288xf32>, vector<8x288xf32> -> vector<8x288xf32>
    %142 = arith.addf %136, %141 : vector<8x288xf32>
    %c0_90 = arith.constant 0 : index
    %c0_91 = arith.constant 0 : index
    %c38 = arith.constant 38 : index
    %143 = vector.load %arg5[%c0_90, %c0_91, %c38] : memref<2x4x326xf32, #tpu.memory_space<vmem>>, vector<1x4x288xf32>
    %144 = vector.shape_cast %143 : vector<1x4x288xf32> to vector<4x288xf32>
    %c8 = arith.constant 8 : index
    %c0_92 = arith.constant 0 : index
    %c0_93 = arith.constant 0 : index
    %145 = vector.load %arg2[%c8, %c0_92, %c0_93] : memref<9x8x4xf32, #tpu.memory_space<vmem>>, vector<1x8x4xf32>
    %146 = vector.shape_cast %145 : vector<1x8x4xf32> to vector<8x4xf32>
    %cst_94 = arith.constant dense<0.000000e+00> : vector<8x288xf32>
    %147 = tpu.matmul %146, %144, %cst_94 {dimension_numbers = #tpu.dot_dimension_numbers<[1], [0], [0], [1], [0, 0, 1, 1], [], []>} : vector<8x4xf32>, vector<4x288xf32>, vector<8x288xf32> -> vector<8x288xf32>
    %148 = arith.addf %142, %147 : vector<8x288xf32>
    %149 = vector.broadcast %93 : vector<8x1xf32> to vector<8x288xf32>
    %150 = arith.addf %148, %149 : vector<8x288xf32>
    %151 = vector.extract_strided_slice %150 {offsets = [0, 0], sizes = [8, 16], strides = [1, 1]} : vector<8x288xf32> to vector<8x16xf32>
    %152 = vector.extract_strided_slice %150 {offsets = [0, 18], sizes = [8, 16], strides = [1, 1]} : vector<8x288xf32> to vector<8x16xf32>
    %153 = vector.extract_strided_slice %150 {offsets = [0, 36], sizes = [8, 16], strides = [1, 1]} : vector<8x288xf32> to vector<8x16xf32>
    %154 = vector.extract_strided_slice %150 {offsets = [0, 54], sizes = [8, 16], strides = [1, 1]} : vector<8x288xf32> to vector<8x16xf32>
    %155 = vector.extract_strided_slice %150 {offsets = [0, 72], sizes = [8, 16], strides = [1, 1]} : vector<8x288xf32> to vector<8x16xf32>
    %156 = vector.extract_strided_slice %150 {offsets = [0, 90], sizes = [8, 16], strides = [1, 1]} : vector<8x288xf32> to vector<8x16xf32>
    %157 = vector.extract_strided_slice %150 {offsets = [0, 108], sizes = [8, 16], strides = [1, 1]} : vector<8x288xf32> to vector<8x16xf32>
    %158 = vector.extract_strided_slice %150 {offsets = [0, 126], sizes = [8, 16], strides = [1, 1]} : vector<8x288xf32> to vector<8x16xf32>
    %159 = vector.extract_strided_slice %150 {offsets = [0, 144], sizes = [8, 16], strides = [1, 1]} : vector<8x288xf32> to vector<8x16xf32>
    %160 = vector.extract_strided_slice %150 {offsets = [0, 162], sizes = [8, 16], strides = [1, 1]} : vector<8x288xf32> to vector<8x16xf32>
    %161 = vector.extract_strided_slice %150 {offsets = [0, 180], sizes = [8, 16], strides = [1, 1]} : vector<8x288xf32> to vector<8x16xf32>
    %162 = vector.extract_strided_slice %150 {offsets = [0, 198], sizes = [8, 16], strides = [1, 1]} : vector<8x288xf32> to vector<8x16xf32>
    %163 = vector.extract_strided_slice %150 {offsets = [0, 216], sizes = [8, 16], strides = [1, 1]} : vector<8x288xf32> to vector<8x16xf32>
    %164 = vector.extract_strided_slice %150 {offsets = [0, 234], sizes = [8, 16], strides = [1, 1]} : vector<8x288xf32> to vector<8x16xf32>
    %165 = vector.extract_strided_slice %150 {offsets = [0, 252], sizes = [8, 16], strides = [1, 1]} : vector<8x288xf32> to vector<8x16xf32>
    %166 = vector.extract_strided_slice %150 {offsets = [0, 270], sizes = [8, 16], strides = [1, 1]} : vector<8x288xf32> to vector<8x16xf32>
    %167 = tpu.concatenate %151, %152, %153, %154, %155, %156, %157, %158, %159, %160, %161, %162, %163, %164, %165, %166 in 1 : vector<8x16xf32>, vector<8x16xf32>, vector<8x16xf32>, vector<8x16xf32>, vector<8x16xf32>, vector<8x16xf32>, vector<8x16xf32>, vector<8x16xf32>, vector<8x16xf32>, vector<8x16xf32>, vector<8x16xf32>, vector<8x16xf32>, vector<8x16xf32>, vector<8x16xf32>, vector<8x16xf32>, vector<8x16xf32> -> vector<8x256xf32>
    %c0_95 = arith.constant 0 : index
    %c0_96 = arith.constant 0 : index
    %c0_97 = arith.constant 0 : index
    %168 = vector.load %arg4[%c0_95, %c0_96, %c0_97] : memref<2x8x256xf32, #tpu.memory_space<vmem>>, vector<1x8x256xf32>
    %169 = vector.shape_cast %168 : vector<1x8x256xf32> to vector<8x256xf32>
    %170 = vector.shape_cast %167 : vector<8x256xf32> to vector<1x8x256xf32>
    tpu.vector_store %arg4[%c0_95, %c0_96, %c0_97], %170 {strides = array<i32>} : memref<2x8x256xf32, #tpu.memory_space<vmem>>, vector<1x8x256xf32>,
    %cst_98 = arith.constant 0.000000e+00 : f32
    %171 = vector.broadcast %cst_98 : f32 to vector<8x288xf32>
    %c1_99 = arith.constant 1 : index
    %c0_100 = arith.constant 0 : index
    %c0_101 = arith.constant 0 : index
    %172 = vector.load %arg5[%c1_99, %c0_100, %c0_101] : memref<2x4x326xf32, #tpu.memory_space<vmem>>, vector<1x4x288xf32>
    %173 = vector.shape_cast %172 : vector<1x4x288xf32> to vector<4x288xf32>
    %c0_102 = arith.constant 0 : index
    %c0_103 = arith.constant 0 : index
    %c0_104 = arith.constant 0 : index
    %174 = vector.load %arg2[%c0_102, %c0_103, %c0_104] : memref<9x8x4xf32, #tpu.memory_space<vmem>>, vector<1x8x4xf32>
    %175 = vector.shape_cast %174 : vector<1x8x4xf32> to vector<8x4xf32>
    %cst_105 = arith.constant dense<0.000000e+00> : vector<8x288xf32>
    %176 = tpu.matmul %175, %173, %cst_105 {dimension_numbers = #tpu.dot_dimension_numbers<[1], [0], [0], [1], [0, 0, 1, 1], [], []>} : vector<8x4xf32>, vector<4x288xf32>, vector<8x288xf32> -> vector<8x288xf32>
    %177 = arith.addf %171, %176 : vector<8x288xf32>
    %c1_106 = arith.constant 1 : index
    %c0_107 = arith.constant 0 : index
    %c1_108 = arith.constant 1 : index
    %178 = vector.load %arg5[%c1_106, %c0_107, %c1_108] : memref<2x4x326xf32, #tpu.memory_space<vmem>>, vector<1x4x288xf32>
    %179 = vector.shape_cast %178 : vector<1x4x288xf32> to vector<4x288xf32>
    %c1_109 = arith.constant 1 : index
    %c0_110 = arith.constant 0 : index
    %c0_111 = arith.constant 0 : index
    %180 = vector.load %arg2[%c1_109, %c0_110, %c0_111] : memref<9x8x4xf32, #tpu.memory_space<vmem>>, vector<1x8x4xf32>
    %181 = vector.shape_cast %180 : vector<1x8x4xf32> to vector<8x4xf32>
    %cst_112 = arith.constant dense<0.000000e+00> : vector<8x288xf32>
    %182 = tpu.matmul %181, %179, %cst_112 {dimension_numbers = #tpu.dot_dimension_numbers<[1], [0], [0], [1], [0, 0, 1, 1], [], []>} : vector<8x4xf32>, vector<4x288xf32>, vector<8x288xf32> -> vector<8x288xf32>
    %183 = arith.addf %177, %182 : vector<8x288xf32>
    %c1_113 = arith.constant 1 : index
    %c0_114 = arith.constant 0 : index
    %c2_115 = arith.constant 2 : index
    %184 = vector.load %arg5[%c1_113, %c0_114, %c2_115] : memref<2x4x326xf32, #tpu.memory_space<vmem>>, vector<1x4x288xf32>
    %185 = vector.shape_cast %184 : vector<1x4x288xf32> to vector<4x288xf32>
    %c2_116 = arith.constant 2 : index
    %c0_117 = arith.constant 0 : index
    %c0_118 = arith.constant 0 : index
    %186 = vector.load %arg2[%c2_116, %c0_117, %c0_118] : memref<9x8x4xf32, #tpu.memory_space<vmem>>, vector<1x8x4xf32>
    %187 = vector.shape_cast %186 : vector<1x8x4xf32> to vector<8x4xf32>
    %cst_119 = arith.constant dense<0.000000e+00> : vector<8x288xf32>
    %188 = tpu.matmul %187, %185, %cst_119 {dimension_numbers = #tpu.dot_dimension_numbers<[1], [0], [0], [1], [0, 0, 1, 1], [], []>} : vector<8x4xf32>, vector<4x288xf32>, vector<8x288xf32> -> vector<8x288xf32>
    %189 = arith.addf %183, %188 : vector<8x288xf32>
    %c1_120 = arith.constant 1 : index
    %c0_121 = arith.constant 0 : index
    %c18_122 = arith.constant 18 : index
    %190 = vector.load %arg5[%c1_120, %c0_121, %c18_122] : memref<2x4x326xf32, #tpu.memory_space<vmem>>, vector<1x4x288xf32>
    %191 = vector.shape_cast %190 : vector<1x4x288xf32> to vector<4x288xf32>
    %c3_123 = arith.constant 3 : index
    %c0_124 = arith.constant 0 : index
    %c0_125 = arith.constant 0 : index
    %192 = vector.load %arg2[%c3_123, %c0_124, %c0_125] : memref<9x8x4xf32, #tpu.memory_space<vmem>>, vector<1x8x4xf32>
    %193 = vector.shape_cast %192 : vector<1x8x4xf32> to vector<8x4xf32>
    %cst_126 = arith.constant dense<0.000000e+00> : vector<8x288xf32>
    %194 = tpu.matmul %193, %191, %cst_126 {dimension_numbers = #tpu.dot_dimension_numbers<[1], [0], [0], [1], [0, 0, 1, 1], [], []>} : vector<8x4xf32>, vector<4x288xf32>, vector<8x288xf32> -> vector<8x288xf32>
    %195 = arith.addf %189, %194 : vector<8x288xf32>
    %c1_127 = arith.constant 1 : index
    %c0_128 = arith.constant 0 : index
    %c19_129 = arith.constant 19 : index
    %196 = vector.load %arg5[%c1_127, %c0_128, %c19_129] : memref<2x4x326xf32, #tpu.memory_space<vmem>>, vector<1x4x288xf32>
    %197 = vector.shape_cast %196 : vector<1x4x288xf32> to vector<4x288xf32>
    %c4_130 = arith.constant 4 : index
    %c0_131 = arith.constant 0 : index
    %c0_132 = arith.constant 0 : index
    %198 = vector.load %arg2[%c4_130, %c0_131, %c0_132] : memref<9x8x4xf32, #tpu.memory_space<vmem>>, vector<1x8x4xf32>
    %199 = vector.shape_cast %198 : vector<1x8x4xf32> to vector<8x4xf32>
    %cst_133 = arith.constant dense<0.000000e+00> : vector<8x288xf32>
    %200 = tpu.matmul %199, %197, %cst_133 {dimension_numbers = #tpu.dot_dimension_numbers<[1], [0], [0], [1], [0, 0, 1, 1], [], []>} : vector<8x4xf32>, vector<4x288xf32>, vector<8x288xf32> -> vector<8x288xf32>
    %201 = arith.addf %195, %200 : vector<8x288xf32>
    %c1_134 = arith.constant 1 : index
    %c0_135 = arith.constant 0 : index
    %c20_136 = arith.constant 20 : index
    %202 = vector.load %arg5[%c1_134, %c0_135, %c20_136] : memref<2x4x326xf32, #tpu.memory_space<vmem>>, vector<1x4x288xf32>
    %203 = vector.shape_cast %202 : vector<1x4x288xf32> to vector<4x288xf32>
    %c5_137 = arith.constant 5 : index
    %c0_138 = arith.constant 0 : index
    %c0_139 = arith.constant 0 : index
    %204 = vector.load %arg2[%c5_137, %c0_138, %c0_139] : memref<9x8x4xf32, #tpu.memory_space<vmem>>, vector<1x8x4xf32>
    %205 = vector.shape_cast %204 : vector<1x8x4xf32> to vector<8x4xf32>
    %cst_140 = arith.constant dense<0.000000e+00> : vector<8x288xf32>
    %206 = tpu.matmul %205, %203, %cst_140 {dimension_numbers = #tpu.dot_dimension_numbers<[1], [0], [0], [1], [0, 0, 1, 1], [], []>} : vector<8x4xf32>, vector<4x288xf32>, vector<8x288xf32> -> vector<8x288xf32>
    %207 = arith.addf %201, %206 : vector<8x288xf32>
    %c1_141 = arith.constant 1 : index
    %c0_142 = arith.constant 0 : index
    %c36_143 = arith.constant 36 : index
    %208 = vector.load %arg5[%c1_141, %c0_142, %c36_143] : memref<2x4x326xf32, #tpu.memory_space<vmem>>, vector<1x4x288xf32>
    %209 = vector.shape_cast %208 : vector<1x4x288xf32> to vector<4x288xf32>
    %c6_144 = arith.constant 6 : index
    %c0_145 = arith.constant 0 : index
    %c0_146 = arith.constant 0 : index
    %210 = vector.load %arg2[%c6_144, %c0_145, %c0_146] : memref<9x8x4xf32, #tpu.memory_space<vmem>>, vector<1x8x4xf32>
    %211 = vector.shape_cast %210 : vector<1x8x4xf32> to vector<8x4xf32>
    %cst_147 = arith.constant dense<0.000000e+00> : vector<8x288xf32>
    %212 = tpu.matmul %211, %209, %cst_147 {dimension_numbers = #tpu.dot_dimension_numbers<[1], [0], [0], [1], [0, 0, 1, 1], [], []>} : vector<8x4xf32>, vector<4x288xf32>, vector<8x288xf32> -> vector<8x288xf32>
    %213 = arith.addf %207, %212 : vector<8x288xf32>
    %c1_148 = arith.constant 1 : index
    %c0_149 = arith.constant 0 : index
    %c37_150 = arith.constant 37 : index
    %214 = vector.load %arg5[%c1_148, %c0_149, %c37_150] : memref<2x4x326xf32, #tpu.memory_space<vmem>>, vector<1x4x288xf32>
    %215 = vector.shape_cast %214 : vector<1x4x288xf32> to vector<4x288xf32>
    %c7_151 = arith.constant 7 : index
    %c0_152 = arith.constant 0 : index
    %c0_153 = arith.constant 0 : index
    %216 = vector.load %arg2[%c7_151, %c0_152, %c0_153] : memref<9x8x4xf32, #tpu.memory_space<vmem>>, vector<1x8x4xf32>
    %217 = vector.shape_cast %216 : vector<1x8x4xf32> to vector<8x4xf32>
    %cst_154 = arith.constant dense<0.000000e+00> : vector<8x288xf32>
    %218 = tpu.matmul %217, %215, %cst_154 {dimension_numbers = #tpu.dot_dimension_numbers<[1], [0], [0], [1], [0, 0, 1, 1], [], []>} : vector<8x4xf32>, vector<4x288xf32>, vector<8x288xf32> -> vector<8x288xf32>
    %219 = arith.addf %213, %218 : vector<8x288xf32>
    %c1_155 = arith.constant 1 : index
    %c0_156 = arith.constant 0 : index
    %c38_157 = arith.constant 38 : index
    %220 = vector.load %arg5[%c1_155, %c0_156, %c38_157] : memref<2x4x326xf32, #tpu.memory_space<vmem>>, vector<1x4x288xf32>
    %221 = vector.shape_cast %220 : vector<1x4x288xf32> to vector<4x288xf32>
    %c8_158 = arith.constant 8 : index
    %c0_159 = arith.constant 0 : index
    %c0_160 = arith.constant 0 : index
    %222 = vector.load %arg2[%c8_158, %c0_159, %c0_160] : memref<9x8x4xf32, #tpu.memory_space<vmem>>, vector<1x8x4xf32>
    %223 = vector.shape_cast %222 : vector<1x8x4xf32> to vector<8x4xf32>
    %cst_161 = arith.constant dense<0.000000e+00> : vector<8x288xf32>
    %224 = tpu.matmul %223, %221, %cst_161 {dimension_numbers = #tpu.dot_dimension_numbers<[1], [0], [0], [1], [0, 0, 1, 1], [], []>} : vector<8x4xf32>, vector<4x288xf32>, vector<8x288xf32> -> vector<8x288xf32>
    %225 = arith.addf %219, %224 : vector<8x288xf32>
    %226 = vector.broadcast %93 : vector<8x1xf32> to vector<8x288xf32>
    %227 = arith.addf %225, %226 : vector<8x288xf32>
    %228 = vector.extract_strided_slice %227 {offsets = [0, 0], sizes = [8, 16], strides = [1, 1]} : vector<8x288xf32> to vector<8x16xf32>
    %229 = vector.extract_strided_slice %227 {offsets = [0, 18], sizes = [8, 16], strides = [1, 1]} : vector<8x288xf32> to vector<8x16xf32>
    %230 = vector.extract_strided_slice %227 {offsets = [0, 36], sizes = [8, 16], strides = [1, 1]} : vector<8x288xf32> to vector<8x16xf32>
    %231 = vector.extract_strided_slice %227 {offsets = [0, 54], sizes = [8, 16], strides = [1, 1]} : vector<8x288xf32> to vector<8x16xf32>
    %232 = vector.extract_strided_slice %227 {offsets = [0, 72], sizes = [8, 16], strides = [1, 1]} : vector<8x288xf32> to vector<8x16xf32>
    %233 = vector.extract_strided_slice %227 {offsets = [0, 90], sizes = [8, 16], strides = [1, 1]} : vector<8x288xf32> to vector<8x16xf32>
    %234 = vector.extract_strided_slice %227 {offsets = [0, 108], sizes = [8, 16], strides = [1, 1]} : vector<8x288xf32> to vector<8x16xf32>
    %235 = vector.extract_strided_slice %227 {offsets = [0, 126], sizes = [8, 16], strides = [1, 1]} : vector<8x288xf32> to vector<8x16xf32>
    %236 = vector.extract_strided_slice %227 {offsets = [0, 144], sizes = [8, 16], strides = [1, 1]} : vector<8x288xf32> to vector<8x16xf32>
    %237 = vector.extract_strided_slice %227 {offsets = [0, 162], sizes = [8, 16], strides = [1, 1]} : vector<8x288xf32> to vector<8x16xf32>
    %238 = vector.extract_strided_slice %227 {offsets = [0, 180], sizes = [8, 16], strides = [1, 1]} : vector<8x288xf32> to vector<8x16xf32>
    %239 = vector.extract_strided_slice %227 {offsets = [0, 198], sizes = [8, 16], strides = [1, 1]} : vector<8x288xf32> to vector<8x16xf32>
    %240 = vector.extract_strided_slice %227 {offsets = [0, 216], sizes = [8, 16], strides = [1, 1]} : vector<8x288xf32> to vector<8x16xf32>
    %241 = vector.extract_strided_slice %227 {offsets = [0, 234], sizes = [8, 16], strides = [1, 1]} : vector<8x288xf32> to vector<8x16xf32>
    %242 = vector.extract_strided_slice %227 {offsets = [0, 252], sizes = [8, 16], strides = [1, 1]} : vector<8x288xf32> to vector<8x16xf32>
    %243 = vector.extract_strided_slice %227 {offsets = [0, 270], sizes = [8, 16], strides = [1, 1]} : vector<8x288xf32> to vector<8x16xf32>
    %244 = tpu.concatenate %228, %229, %230, %231, %232, %233, %234, %235, %236, %237, %238, %239, %240, %241, %242, %243 in 1 : vector<8x16xf32>, vector<8x16xf32>, vector<8x16xf32>, vector<8x16xf32>, vector<8x16xf32>, vector<8x16xf32>, vector<8x16xf32>, vector<8x16xf32>, vector<8x16xf32>, vector<8x16xf32>, vector<8x16xf32>, vector<8x16xf32>, vector<8x16xf32>, vector<8x16xf32>, vector<8x16xf32>, vector<8x16xf32> -> vector<8x256xf32>
    %c1_162 = arith.constant 1 : index
    %c0_163 = arith.constant 0 : index
    %c0_164 = arith.constant 0 : index
    %245 = vector.load %arg4[%c1_162, %c0_163, %c0_164] : memref<2x8x256xf32, #tpu.memory_space<vmem>>, vector<1x8x256xf32>
    %246 = vector.shape_cast %245 : vector<1x8x256xf32> to vector<8x256xf32>
    %247 = vector.shape_cast %244 : vector<8x256xf32> to vector<1x8x256xf32>
    tpu.vector_store %arg4[%c1_162, %c0_163, %c0_164], %247 {strides = array<i32>} : memref<2x8x256xf32, #tpu.memory_space<vmem>>, vector<1x8x256xf32>,
    return
  }
  func.func @transform_0(%arg0: i32) -> (i32, i32, i32) {
    %c0_i32 = arith.constant 0 : i32
    %c0_i32_0 = arith.constant 0 : i32
    %c0_i32_1 = arith.constant 0 : i32
    %c0_i32_2 = arith.constant 0 : i32
    return %c0_i32, %c0_i32_0, %c0_i32_1 : i32, i32, i32
  }
  func.func @transform_1(%arg0: i32) -> (i32, i32, i32) {
    %c0_i32 = arith.constant 0 : i32
    %c0_i32_0 = arith.constant 0 : i32
    %c0_i32_1 = arith.constant 0 : i32
    %c0_i32_2 = arith.constant 0 : i32
    return %c0_i32, %c0_i32_0, %c0_i32_1 : i32, i32, i32
  }
  func.func @transform_2(%arg0: i32) -> (i32, i32) {
    %c0_i32 = arith.constant 0 : i32
    %c0_i32_0 = arith.constant 0 : i32
    %c0_i32_1 = arith.constant 0 : i32
    return %c0_i32, %c0_i32_0 : i32, i32
  }
  func.func @transform_3(%arg0: i32) -> (i32, i32, i32) {
    %c0_i32 = arith.constant 0 : i32
    %c0_i32_0 = arith.constant 0 : i32
    %c0_i32_1 = arith.constant 0 : i32
    %c0_i32_2 = arith.constant 0 : i32
    return %c0_i32, %c0_i32_0, %c0_i32_1 : i32, i32, i32
  }
}

</mosaic_0001>

<bundles_post_ra>
// kernel: tpu_custom_call.1
= control target key start
LH: loop header
LB: loop body
LE: loop exit
PB: predicated region body
PF: predicated region fallthrough
CT: control target
= control target key end

     0   :  { %s4096_s14 = smov 111   ;;  %s4097_s15 = smov 127   ;;  %s4955_s0 = inlined_call_operand.vmem [shape: f32[2,4,256], index: 0, kind: input, shape index: {}]   ;;  %s4956_s1 = inlined_call_operand.vmem [shape: f32[9,8,4], index: 1, kind: input, shape index: {}]   ;;  %s4957_s2 = inlined_call_operand.vmem [shape: f32[8,1], index: 2, kind: input, shape index: {}]   ;;  %s4958_s3 = inlined_call_operand.hbm [shape: f32[2,8,256], index: 3, kind: output, shape index: {}]  }
   0x1   :  { %v15_v0 = vld [vmem:[%s4955_s0] sm:$0xff] }
   0x2   :  { %19 = vrot.lane.b32.xlu1 %v15_v0, %s4096_s14  ;;  %46 = vrot.lane.b32.xlu0 %v15_v0, %s4097_s15 }
   0x3   :  { %8 = vsyncpa [#allocation4], 0  ;;  %s4098_s16 = smov 113   ;;  %s4099_s17 = smov 1   ;;  %v295_v1 = vcombine.high %v15_v0, %v15_v0  ;;  %v4230_v2 = vld [vmem:[%s4955_s0 + $0x8] sm:$0xff]  ;;  %vm37_vm0 = vcmask 7168  }
   0x4   :  { %s4100_s18 = smov 115   ;;  %s4101_s19 = smov 3   ;;  %vm40_vm1 = vcmask 138240   ;;  %vm43_vm2 = vcmask 142336   ;;  %vm76_vm3 = vcmask 289936   ;;  %vm87_vm4 = vcmask 437536  }
   0x5   :  { %s4102_s20 = smov 97   ;;  %s4103_s21 = smov 95   ;;  %vm120_vm5 = vcmask 585136   ;;  %vm153_vm6 = vcmask 732736   ;;  %vm186_vm7 = vcmask 880336   ;;  %vm257_vm8 = vcmask 1044464  }
   0x6   :  { %25 = vrot.lane.b32.xlu1 %v15_v0, %s4098_s16  ;;  %52 = vrot.lane.b32.xlu0 %v15_v0, %s4099_s17  ;;  %s4104_s22 = smov 79   ;;  %s4105_s23 = smov 99   ;;  %vm258_vm9 = vcmask 130052   ;;  %vm252_vm10 = vcmask 1031168   ;;  %vm219_vm11 = vcmask 1027936   ;;  %vm4980_vm13 = vcmask 273536  }
   0x7   :  { %s4106_s24 = smov 31   ;;  %s4107_s25 = smov 81   ;;  %vm4359_vm12 = vmor %vm258_vm9, %vm257_vm8  ;;  %vm4979_vm14 = vcmask 421136   ;;  %vm4978_vm15 = vcmask 568736   ;;  %vm4977_vm8 = vcmask 716336   ;;  %vm497_vm9 = vcmask 1044448  }
   0x8   :  { %s4108_s26 = smov 83   ;;  %s4109_s27 = smov 33  }
   0x9   :  { %s4110_s28 = smov 65   ;;  %s4111_s29 = smov 63  }
   0xa   :  { %31 = vrot.lane.b32.xlu1 %v15_v0, %s4100_s18  ;;  %58 = vrot.lane.b32.xlu0 %v15_v0, %s4101_s19  ;;  %s4112_s30 = smov 67   ;;  %s4113_s4 = smov 35  }
   0xb   :  { %s4114_s5 = smov 49   ;;  %s4115_s6 = smov 47  }
   0xc   :  { %s4116_s7 = smov 15   ;;  %s4117_s8 = smov 51  }
   0xd   :  { %s4118_s9 = smov 19   ;;  %s4119_s10 = smov 17  }
   0xe   :  { %96 = vrot.lane.b32.xlu1 %v15_v0, %s4102_s20  ;;  %90 = vrot.lane.b32.xlu0 %v15_v0, %s4103_s21  ;;  %s4960_s0 = smov 36   ;;  %s4121_s13 = smov 18  }
   0xf   :  { %s4959_s11 = smov 54   ;;  %s4961_s12 = smov 72  }
  0x12   :  { %123 = vrot.lane.b32.xlu1 %v15_v0, %s4104_s22  ;;  %102 = vrot.lane.b32.xlu0 %v15_v0, %s4105_s23 }
  0x16   :  { %222 = vrot.lane.b32.xlu1 %v15_v0, %s4106_s24  ;;  %129 = vrot.lane.b32.xlu0 %v15_v0, %s4107_s25 }
  0x1a   :  { %135 = vrot.lane.b32.xlu1 %v15_v0, %s4108_s26  ;;  %228 = vrot.lane.b32.xlu0 %v15_v0, %s4109_s27 }
  0x1e   :  { %162 = vrot.lane.b32.xlu1 %v15_v0, %s4110_s28  ;;  %156 = vrot.lane.b32.xlu0 %v15_v0, %s4111_s29 }
  0x22   :  { %168 = vrot.lane.b32.xlu1 %v15_v0, %s4112_s30  ;;  %234 = vrot.lane.b32.xlu0 %v15_v0, %s4113_s4 }
  0x26   :  { %195 = vrot.lane.b32.xlu1 %v15_v0, %s4114_s5  ;;  %189 = vrot.lane.b32.xlu0 %v15_v0, %s4115_s6 }
  0x2a   :  { %262 = vrot.lane.b32.xlu1 %v15_v0, %s4116_s7  ;;  %201 = vrot.lane.b32.xlu0 %v15_v0, %s4117_s8 }
  0x2e   :  { %274 = vrot.lane.b32.xlu1 %v15_v0, %s4118_s9  ;;  %268 = vrot.lane.b32.xlu0 %v15_v0, %s4119_s10 }
  0x32   :  { %303 = vrot.lane.b32.xlu1 %v295_v1, %s4099_s17  ;;  %297 = vrot.lane.b32.xlu0 %v295_v1, %s4097_s15 }
  0x36   :  { %330 = vrot.lane.b32.xlu1 %v295_v1, %s4096_s14  ;;  %309 = vrot.lane.b32.xlu0 %v295_v1, %s4101_s19 }
  0x3a   :  { %342 = vrot.lane.b32.xlu1 %v295_v1, %s4100_s18  ;;  %336 = vrot.lane.b32.xlu0 %v295_v1, %s4098_s16 }
  0x3e   :  { %369 = vrot.lane.b32.xlu1 %v295_v1, %s4102_s20  ;;  %363 = vrot.lane.b32.xlu0 %v295_v1, %s4103_s21 }
  0x42   :  { %468 = vrot.lane.b32.xlu1 %v295_v1, %s4114_s5  ;;  %462 = vrot.lane.b32.xlu0 %v295_v1, %s4115_s6 }
  0x46   :  { %396 = vrot.lane.b32.xlu1 %v295_v1, %s4104_s22  ;;  %375 = vrot.lane.b32.xlu0 %v295_v1, %s4105_s23 }
  0x4a   :  { %474 = vrot.lane.b32.xlu1 %v295_v1, %s4117_s8  ;;  %402 = vrot.lane.b32.xlu0 %v295_v1, %s4107_s25 }
  0x4e   :  { %408 = vrot.lane.b32.xlu0 %v295_v1, %s4108_s26  ;;  %429 = vrot.lane.b32.xlu1 %v295_v1, %s4111_s29 }
  0x52   :  { %435 = vrot.lane.b32.xlu0 %v295_v1, %s4110_s28  ;;  %441 = vrot.lane.b32.xlu1 %v295_v1, %s4112_s30 }
  0x56   :  { %502 = vrot.lane.b32.xlu0 %v295_v1, %s4106_s24  ;;  %508 = vrot.lane.b32.xlu1 %v295_v1, %s4109_s27 }
  0x5a   :  { %514 = vrot.lane.b32.xlu0 %v295_v1, %s4113_s4  ;;  %535 = vrot.lane.b32.xlu1 %v295_v1, %s4116_s7 }
  0x5e   :  { %541 = vrot.lane.b32.xlu0 %v295_v1, %s4119_s10  ;;  %547 = vrot.lane.b32.xlu1 %v295_v1, %s4118_s9 }
  0x62   :  { %54 = vrot.lane.b32.xlu1 %v4230_v2, %s4099_s17  ;;  %48 = vrot.lane.b32.xlu0 %v4230_v2, %s4097_s15 }
  0x66   :  { %21 = vrot.lane.b32.xlu1 %v4230_v2, %s4096_s14  ;;  %27 = vrot.lane.b32.xlu0 %v4230_v2, %s4098_s16 }
  0x74   :  { %v20_v3 = vpop.permute.xlu1 %19  ;;  %v47_v4 = vpop.permute.xlu0 %46 }
  0x78   :  { %v26_v5 = vpop.permute.xlu1 %25  ;;  %v53_v6 = vpop.permute.xlu0 %52 }
  0x79   :  { %v38_v7 = vsel %vm37_vm0, %v20_v3, %v26_v5  ;;  %v64_v8 = vsel %vm37_vm0, %v47_v4, %v53_v6 }
  0x7c   :  { %v32_v9 = vpop.permute.xlu1 %31  ;;  %v59_v10 = vpop.permute.xlu0 %58 }
  0x7d   :  { %v41_v11 = vsel %vm40_vm1, %v38_v7, %v32_v9  ;;  %v66_v12 = vsel %vm40_vm1, %v64_v8, %v59_v10 }
  0x7e   :  { %44 = vst.msk [vmem:[#allocation2] sm:$0xf] %vm43_vm2, %v41_v11  ;;  %81 = vrot.lane.b32.xlu1 %v41_v11, %s4960_s0  ;;  %70 = vrot.lane.b32.xlu0 %v66_v12, %s4121_s13  ;;  %s4125_s0 = smov 126  }
  0x80   :  { %v97_v13 = vpop.permute.xlu1 %96  ;;  %v91_v14 = vpop.permute.xlu0 %90 }
  0x81   :  { %v108_v15 = vsel %vm37_vm0, %v91_v14, %v97_v13 }
  0x84   :  { %v124_v16 = vpop.permute.xlu1 %123  ;;  %v103_v17 = vpop.permute.xlu0 %102 }
  0x85   :  { %v110_v18 = vsel %vm40_vm1, %v108_v15, %v103_v17 }
  0x86   :  { %114 = vrot.lane.b32.xlu0 %v110_v18, %s4959_s11  ;;  %s4962_s11 = smov 90  }
  0x88   :  { %v223_v19 = vpop.permute.xlu1 %222  ;;  %v130_v20 = vpop.permute.xlu0 %129 }
  0x89   :  { %v141_v21 = vsel %vm37_vm0, %v124_v16, %v130_v20  ;;  %v4135_v20 = vmov 0.0  }
  0x8a   :  { %673 = vmatprep.mubr.f32.mxu0 %v4135_v20  ;;  %3886 = vmatprep.subr.mxu1 %v4135_v20 }
  0x8c   :  { %v136_v22 = vpop.permute.xlu1 %135  ;;  %v229_v23 = vpop.permute.xlu0 %228 }
  0x8d   :  { %v143_v24 = vsel %vm40_vm1, %v141_v21, %v136_v22  ;;  %v240_v27 = vsel %vm37_vm0, %v223_v19, %v229_v23  ;;  %v296_v21 = vcombine.high %v4230_v2, %v4230_v2 }
  0x8e   :  { %147 = vrot.lane.b32.xlu1 %v143_v24, %s4961_s12  ;;  %s4964_s12 = smov 108  }
  0x90   :  { %v163_v25 = vpop.permute.xlu1 %162  ;;  %v157_v26 = vpop.permute.xlu0 %156 }
  0x91   :  { %v174_v28 = vsel %vm37_vm0, %v157_v26, %v163_v25 }
  0x94   :  { %v169_v29 = vpop.permute.xlu1 %168  ;;  %v235_v30 = vpop.permute.xlu0 %234 }
  0x95   :  { %v176_v31 = vsel %vm40_vm1, %v174_v28, %v169_v29  ;;  %v242_v32 = vsel %vm40_vm1, %v240_v27, %v235_v30 }
  0x96   :  { %180 = vrot.lane.b32.xlu1 %v176_v31, %s4962_s11  ;;  %246 = vrot.lane.b32.xlu0 %v242_v32, %s4125_s0  ;;  %s4966_s11 = smov 16  }
  0x98   :  { %v196_v33 = vpop.permute.xlu1 %195  ;;  %v190_v34 = vpop.permute.xlu0 %189 }
  0x99   :  { %v207_v35 = vsel %vm37_vm0, %v190_v34, %v196_v33 }
  0x9c   :  { %v263_v36 = vpop.permute.xlu1 %262  ;;  %v202_v37 = vpop.permute.xlu0 %201 }
  0x9d   :  { %v209_v38 = vsel %vm40_vm1, %v207_v35, %v202_v37 }
  0x9e   :  { %213 = vrot.lane.b32.xlu0 %v209_v38, %s4964_s12  ;;  %s4968_s12 = smov 34  }
  0xa0   :  { %v275_v39 = vpop.permute.xlu1 %274  ;;  %v269_v40 = vpop.permute.xlu0 %268 }
  0xa1   :  { %v280_v41 = vsel %vm37_vm0, %v263_v36, %v269_v40 }
  0xa2   :  { %v282_v42 = vsel %vm40_vm1, %v280_v41, %v275_v39 }
  0xa3   :  { %286 = vrot.lane.b32.xlu1 %v282_v42, %s4966_s11  ;;  %s4969_s11 = smov 52  }
  0xa4   :  { %v304_v43 = vpop.permute.xlu1 %303  ;;  %v298_v44 = vpop.permute.xlu0 %297 }
  0xa5   :  { %v315_v45 = vsel %vm37_vm0, %v298_v44, %v304_v43 }
  0xa7   :  { %60 = vrot.lane.b32.xlu1 %v4230_v2, %s4101_s19 }
  0xa8   :  { %v331_v46 = vpop.permute.xlu1 %330  ;;  %v310_v47 = vpop.permute.xlu0 %309 }
  0xa9   :  { %v317_v48 = vsel %vm40_vm1, %v315_v45, %v310_v47 }
  0xaa   :  { %321 = vrot.lane.b32.xlu0 %v317_v48, %s4968_s12  ;;  %s4972_s12 = smov 70  }
  0xab   :  { %33 = vrot.lane.b32.xlu1 %v4230_v2, %s4100_s18 }
  0xac   :  { %v343_v49 = vpop.permute.xlu1 %342  ;;  %v337_v50 = vpop.permute.xlu0 %336 }
  0xad   :  { %v348_v51 = vsel %vm37_vm0, %v331_v46, %v337_v50 }
  0xae   :  { %v350_v52 = vsel %vm40_vm1, %v348_v51, %v343_v49 }
  0xaf   :  { %354 = vrot.lane.b32.xlu0 %v350_v52, %s4969_s11  ;;  %98 = vrot.lane.b32.xlu1 %v4230_v2, %s4102_s20  ;;  %s4970_s11 = smov 124  }
  0xb0   :  { %v370_v53 = vpop.permute.xlu1 %369  ;;  %v364_v54 = vpop.permute.xlu0 %363 }
  0xb1   :  { %v381_v57 = vsel %vm37_vm0, %v364_v54, %v370_v53 }
  0xb3   :  { %92 = vrot.lane.b32.xlu0 %v4230_v2, %s4103_s21 }
  0xb4   :  { %v469_v55 = vpop.permute.xlu1 %468  ;;  %v463_v56 = vpop.permute.xlu0 %462 }
  0xb5   :  { %v480_v61 = vsel %vm37_vm0, %v463_v56, %v469_v55 }
  0xb8   :  { %v397_v58 = vpop.permute.xlu1 %396  ;;  %v376_v59 = vpop.permute.xlu0 %375 }
  0xb9   :  { %v383_v60 = vsel %vm40_vm1, %v381_v57, %v376_v59 }
  0xba   :  { %387 = vrot.lane.b32.xlu0 %v383_v60, %s4972_s12  ;;  %s4973_s12 = smov 106  }
  0xbc   :  { %v475_v62 = vpop.permute.xlu1 %474  ;;  %v403_v0 = vpop.permute.xlu0 %402 }
  0xbd   :  { %v482_v63 = vsel %vm40_vm1, %v480_v61, %v475_v62  ;;  %v414_v4 = vsel %vm37_vm0, %v397_v58, %v403_v0 }
  0xbe   :  { %486 = vrot.lane.b32.xlu1 %v482_v63, %s4970_s11  ;;  %104 = vrot.lane.b32.xlu0 %v4230_v2, %s4105_s23  ;;  %s4975_s11 = smov 88  }
  0xc0   :  { %v409_v1 = vpop.permute.xlu0 %408  ;;  %v430_v3 = vpop.permute.xlu1 %429 }
  0xc1   :  { %v416_v5 = vsel %vm40_vm1, %v414_v4, %v409_v1 }
  0xc2   :  { %125 = vrot.lane.b32.xlu1 %v4230_v2, %s4104_s22  ;;  %131 = vrot.lane.b32.xlu0 %v4230_v2, %s4107_s25 }
  0xc4   :  { %v436_v6 = vpop.permute.xlu0 %435  ;;  %v442_v8 = vpop.permute.xlu1 %441 }
  0xc5   :  { %v447_v7 = vsel %vm37_vm0, %v430_v3, %v436_v6 }
  0xc6   :  { %224 = vrot.lane.b32.xlu1 %v4230_v2, %s4106_s24  ;;  %230 = vrot.lane.b32.xlu0 %v4230_v2, %s4109_s27  ;;  %v449_v9 = vsel %vm40_vm1, %v447_v7, %v442_v8 }
  0xc8   :  { %v503_v10 = vpop.permute.xlu0 %502  ;;  %v509_v11 = vpop.permute.xlu1 %508 }
  0xc9   :  { %v520_v15 = vsel %vm37_vm0, %v503_v10, %v509_v11 }
  0xca   :  { %137 = vrot.lane.b32.xlu0 %v4230_v2, %s4108_s26  ;;  %420 = vrot.lane.b32.xlu1 %v416_v5, %s4975_s11  ;;  %s4136_s11 = smov 32  }
  0xcc   :  { %v515_v12 = vpop.permute.xlu0 %514  ;;  %v536_v13 = vpop.permute.xlu1 %535 }
  0xcd   :  { %v522_v18 = vsel %vm40_vm1, %v520_v15, %v515_v12 }
  0xce   :  { %164 = vrot.lane.b32.xlu0 %v4230_v2, %s4110_s28  ;;  %158 = vrot.lane.b32.xlu1 %v4230_v2, %s4111_s29 }
  0xd0   :  { %v542_v14 = vpop.permute.xlu0 %541  ;;  %v548_v17 = vpop.permute.xlu1 %547 }
  0xd1   :  { %v553_v16 = vsel %vm37_vm0, %v536_v13, %v542_v14 }
  0xd2   :  { %236 = vrot.lane.b32.xlu1 %v4230_v2, %s4113_s4  ;;  %453 = vrot.lane.b32.xlu0 %v449_v9, %s4973_s12  ;;  %s4976_s12 = smov 14   ;;  %v555_v19 = vsel %vm40_vm1, %v553_v16, %v548_v17 }
  0xd4   :  { %v55_v22 = vpop.permute.xlu1 %54  ;;  %v49_v23 = vpop.permute.xlu0 %48 }
  0xd5   :  { %v65_v36 = vsel %vm37_vm0, %v49_v23, %v55_v22 }
  0xd6   :  { %170 = vrot.lane.b32.xlu1 %v4230_v2, %s4112_s30  ;;  %191 = vrot.lane.b32.xlu0 %v4230_v2, %s4115_s6 }
  0xd8   :  { %v22_v24 = vpop.permute.xlu1 %21  ;;  %v28_v25 = vpop.permute.xlu0 %27 }
  0xd9   :  { %v39_v40 = vsel %vm37_vm0, %v22_v24, %v28_v25 }
  0xda   :  { %197 = vrot.lane.b32.xlu1 %v4230_v2, %s4114_s5  ;;  %203 = vrot.lane.b32.xlu0 %v4230_v2, %s4117_s8 }
  0xde   :  { %264 = vrot.lane.b32.xlu0 %v4230_v2, %s4116_s7  ;;  %526 = vrot.lane.b32.xlu1 %v522_v18, %s4976_s12  ;;  %s4137_s12 = smov 50  }
  0xe2   :  { %270 = vrot.lane.b32.xlu1 %v4230_v2, %s4119_s10  ;;  %559 = vrot.lane.b32.xlu0 %v555_v19, %s4136_s11 }
  0xe6   :  { %276 = vrot.lane.b32.xlu1 %v4230_v2, %s4118_s9  ;;  %299 = vrot.lane.b32.xlu0 %v296_v21, %s4097_s15 }
  0xea   :  { %305 = vrot.lane.b32.xlu1 %v296_v21, %s4099_s17  ;;  %568 = vrot.lane.b32.xlu0 %v522_v18, %s4137_s12  ;;  %s4987_s17 = smov 72  }
  0xee   :  { %311 = vrot.lane.b32.xlu1 %v296_v21, %s4101_s19  ;;  %332 = vrot.lane.b32.xlu0 %v296_v21, %s4096_s14  ;;  %s4985_s14 = smov 36   ;;  %s4991_s19 = smov 108  }
  0xf0   :  { %v82_v26 = vpop.permute.xlu1 %81  ;;  %v71_v27 = vpop.permute.xlu0 %70 }
  0xf1   :  { %77 = vst.msk [vmem:[#allocation2] sm:$0xf] %vm76_vm3, %v71_v27 }
  0xf2   :  { %338 = vrot.lane.b32.xlu1 %v296_v21, %s4098_s16  ;;  %344 = vrot.lane.b32.xlu0 %v296_v21, %s4100_s18  ;;  %88 = vst.msk [vmem:[#allocation2] sm:$0xf] %vm87_vm4, %v82_v26  ;;  %s4986_s16 = smov 54   ;;  %s4990_s18 = smov 90  }
  0xf6   :  { %365 = vrot.lane.b32.xlu1 %v296_v21, %s4103_s21  ;;  %371 = vrot.lane.b32.xlu0 %v296_v21, %s4102_s20  ;;  %s4992_s20 = smov 16   ;;  %s4993_s21 = smov 34  }
  0xf8   :  { %v115_v2 = vpop.permute.xlu0 %114 }
  0xf9   :  { %121 = vst.msk [vmem:[#allocation2] sm:$0xf] %vm120_vm5, %v115_v2 }
  0xfa   :  { %464 = vrot.lane.b32.xlu1 %v296_v21, %s4115_s6  ;;  %470 = vrot.lane.b32.xlu0 %v296_v21, %s4114_s5  ;;  %s4148_s5 = smov 112   ;;  %s4149_s6 = smov 118  }
  0xfe   :  { %377 = vrot.lane.b32.xlu1 %v296_v21, %s4105_s23  ;;  %398 = vrot.lane.b32.xlu0 %v296_v21, %s4104_s22  ;;  %s4994_s22 = smov 52   ;;  %s4995_s23 = smov 70  }
 0x100   :  { %v148_v28 = vpop.permute.xlu1 %147 }
 0x101   :  { %154 = vst.msk [vmem:[#allocation2] sm:$0xf] %vm153_vm6, %v148_v28 }
 0x102   :  { %404 = vrot.lane.b32.xlu1 %v296_v21, %s4107_s25  ;;  %476 = vrot.lane.b32.xlu0 %v296_v21, %s4117_s8  ;;  %s4997_s25 = smov 88   ;;  %s4151_s8 = smov 104  }
 0x106   :  { %410 = vrot.lane.b32.xlu1 %v296_v21, %s4108_s26  ;;  %431 = vrot.lane.b32.xlu0 %v296_v21, %s4111_s29  ;;  %s4998_s26 = smov 106   ;;  %s4139_s29 = smov 109  }
 0x108   :  { %v181_v29 = vpop.permute.xlu1 %180  ;;  %v247_v30 = vpop.permute.xlu0 %246 }
 0x109   :  { %187 = vst.msk [vmem:[#allocation2] sm:$0xf] %vm186_vm7, %v181_v29  ;;  %v250_v31 = vrot.slane %v247_v30, 4 }
 0x10a   :  { %437 = vrot.lane.b32.xlu1 %v296_v21, %s4110_s28  ;;  %443 = vrot.lane.b32.xlu0 %v296_v21, %s4112_s30  ;;  %s4138_s28 = smov 110   ;;  %s4141_s30 = smov 92  }
 0x10b   :  { %v253_v34 = vsel %vm252_vm10, %v250_v31, %v247_v30 }
 0x10e   :  { %504 = vrot.lane.b32.xlu1 %v296_v21, %s4106_s24  ;;  %510 = vrot.lane.b32.xlu0 %v296_v21, %s4109_s27  ;;  %s4996_s24 = smov 124   ;;  %s4999_s27 = smov 14  }
 0x110   :  { %v214_v33 = vpop.permute.xlu0 %213 }
 0x111   :  { %220 = vst.msk [vmem:[#allocation2] sm:$0xf] %vm219_vm11, %v214_v33 }
 0x112   :  { %260 = vst.msk [vmem:[#allocation2] sm:$0xff] %vm4359_vm12, %v253_v34  ;;  %516 = vrot.lane.b32.xlu1 %v296_v21, %s4113_s4  ;;  %537 = vrot.lane.b32.xlu0 %v296_v21, %s4116_s7  ;;  %s4142_s4 = smov 91   ;;  %s4150_s7 = smov 116  }
 0x115   :  { %v287_v35 = vpop.permute.xlu1 %286 }
 0x116   :  { %293 = vst.msk [vmem:[#allocation2 + $0x4] sm:$0xf] %vm4980_vm13, %v287_v35  ;;  %543 = vrot.lane.b32.xlu1 %v296_v21, %s4119_s10  ;;  %549 = vrot.lane.b32.xlu0 %v296_v21, %s4118_s9  ;;  %s4152_s9 = smov 102  }
 0x119   :  { %v61_v37 = vpop.permute.xlu1 %60 }
 0x11a   :  { %v67_v38 = vsel %vm40_vm1, %v65_v36, %v61_v37 }
 0x11b   :  { %72 = vrot.lane.b32.xlu1 %v67_v38, %s4121_s13 }
 0x11c   :  { %v322_v39 = vpop.permute.xlu0 %321 }
 0x11d   :  { %328 = vst.msk [vmem:[#allocation2 + $0x4] sm:$0xf] %vm4979_vm14, %v322_v39  ;;  %v34_v41 = vpop.permute.xlu1 %33  ;;  %vm4981_vm14 = vcmask 1011536  }
 0x11e   :  { %v42_v42 = vsel %vm40_vm1, %v39_v40, %v34_v41 }
 0x11f   :  { %45 = vst.msk [vmem:[#allocation2 + $0xc] sm:$0xf] %vm43_vm2, %v42_v42  ;;  %83 = vrot.lane.b32.xlu0 %v42_v42, %s4985_s14  ;;  %vm426_vm2 = vcmask 863936  }
 0x121   :  { %v355_v43 = vpop.permute.xlu0 %354  ;;  %v99_v45 = vpop.permute.xlu1 %98 }
 0x122   :  { %361 = vst.msk [vmem:[#allocation2 + $0x4] sm:$0xf] %vm4978_vm15, %v355_v43  ;;  %vm4982_vm15 = vcmask 1014784  }
 0x125   :  { %v93_v44 = vpop.permute.xlu0 %92 }
 0x126   :  { %v109_v47 = vsel %vm37_vm0, %v93_v44, %v99_v45 }
 0x12c   :  { %v388_v46 = vpop.permute.xlu0 %387 }
 0x12d   :  { %394 = vst.msk [vmem:[#allocation2 + $0x4] sm:$0xf] %vm4977_vm8, %v388_v46  ;;  %vm498_vm8 = vcmask 113668  }
 0x12e   :  { %vm4389_vm13 = vmor %vm498_vm8, %vm497_vm9  ;;  %vm532_vm8 = vcmask 257136   ;;  %vm565_vm9 = vcmask 404736  }
 0x130   :  { %v487_v48 = vpop.permute.xlu1 %486  ;;  %v105_v49 = vpop.permute.xlu0 %104 }
 0x131   :  { %v111_v50 = vsel %vm40_vm1, %v109_v47, %v105_v49  ;;  %v490_v61 = vrot.slane %v487_v48, 4 }
 0x132   :  { %116 = vrot.lane.b32.xlu1 %v111_v50, %s4986_s16 }
 0x133   :  { %v493_v3 = vsel %vm4982_vm15, %v490_v61, %v487_v48  ;;  %vm577_vm15 = vcmask 568864  }
 0x134   :  { %v126_v51 = vpop.permute.xlu1 %125  ;;  %v132_v52 = vpop.permute.xlu0 %131 }
 0x135   :  { %v142_v55 = vsel %vm37_vm0, %v126_v51, %v132_v52 }
 0x138   :  { %v225_v53 = vpop.permute.xlu1 %224  ;;  %v231_v54 = vpop.permute.xlu0 %230 }
 0x139   :  { %v241_v63 = vsel %vm37_vm0, %v225_v53, %v231_v54 }
 0x13c   :  { %v421_v56 = vpop.permute.xlu1 %420  ;;  %v138_v57 = vpop.permute.xlu0 %137 }
 0x13d   :  { %427 = vst.msk [vmem:[#allocation2 + $0x4] sm:$0xf] %vm426_vm2, %v421_v56  ;;  %v144_v58 = vsel %vm40_vm1, %v142_v55, %v138_v57 }
 0x13e   :  { %149 = vrot.lane.b32.xlu0 %v144_v58, %s4987_s17 }
 0x140   :  { %v159_v59 = vpop.permute.xlu1 %158  ;;  %v165_v60 = vpop.permute.xlu0 %164 }
 0x141   :  { %v175_v5 = vsel %vm37_vm0, %v159_v59, %v165_v60 }
 0x144   :  { %v237_v0 = vpop.permute.xlu1 %236  ;;  %v454_v1 = vpop.permute.xlu0 %453 }
 0x145   :  { %v243_v4 = vsel %vm40_vm1, %v241_v63, %v237_v0  ;;  %460 = vst.msk [vmem:[#allocation2 + $0x4] sm:$0xf] %vm4981_vm14, %v454_v1  ;;  %vm574_vm14 = vcmask 552336  }
 0x146   :  { %500 = vst.msk [vmem:[#allocation2 + $0x4] sm:$0xff] %vm4389_vm13, %v493_v3  ;;  %248 = vrot.lane.b32.xlu1 %v243_v4, %s4125_s0 }
 0x148   :  { %v171_v6 = vpop.permute.xlu1 %170  ;;  %v192_v7 = vpop.permute.xlu0 %191 }
 0x149   :  { %v177_v8 = vsel %vm40_vm1, %v175_v5, %v171_v6 }
 0x14a   :  { %182 = vrot.lane.b32.xlu0 %v177_v8, %s4990_s18 }
 0x14c   :  { %v198_v9 = vpop.permute.xlu1 %197  ;;  %v204_v10 = vpop.permute.xlu0 %203 }
 0x14d   :  { %v208_v11 = vsel %vm37_vm0, %v192_v7, %v198_v9  ;;  %v4434_v58 = vld [vmem:[#allocation2] sm:$0xff] }
 0x14e   :  { %v210_v12 = vsel %vm40_vm1, %v208_v11, %v204_v10  ;;  %v4439_v61 = vcombine.high %v4434_v58, %v4434_v58 }
 0x14f   :  { %215 = vrot.lane.b32.xlu1 %v210_v12, %s4991_s19 }
 0x150   :  { %v527_v13 = vpop.permute.xlu1 %526  ;;  %v265_v14 = vpop.permute.xlu0 %264 }
 0x151   :  { %533 = vst.msk [vmem:[#allocation2 + $0x8] sm:$0xf] %vm532_vm8, %v527_v13 }
 0x154   :  { %v271_v15 = vpop.permute.xlu1 %270  ;;  %v560_v16 = vpop.permute.xlu0 %559 }
 0x155   :  { %566 = vst.msk [vmem:[#allocation2 + $0x8] sm:$0xf] %vm565_vm9, %v560_v16  ;;  %v281_v17 = vsel %vm37_vm0, %v265_v14, %v271_v15 }
 0x158   :  { %v277_v18 = vpop.permute.xlu1 %276  ;;  %v300_v19 = vpop.permute.xlu0 %299 }
 0x159   :  { %v283_v21 = vsel %vm40_vm1, %v281_v17, %v277_v18 }
 0x15a   :  { %288 = vrot.lane.b32.xlu0 %v283_v21, %s4992_s20 }
 0x15c   :  { %v306_v22 = vpop.permute.xlu1 %305  ;;  %v569_v23 = vpop.permute.xlu0 %568 }
 0x15d   :  { %575 = vst.msk [vmem:[#allocation2 + $0x8] sm:$0xf] %vm574_vm14, %v569_v23  ;;  %v316_v24 = vsel %vm37_vm0, %v300_v19, %v306_v22 }
 0x15e   :  { %578 = vst.msk [vmem:[#allocation2 + $0x8] sm:$0xf] %vm577_vm15, %v4135_v20 }
 0x160   :  { %v312_v25 = vpop.permute.xlu1 %311  ;;  %v333_v26 = vpop.permute.xlu0 %332 }
 0x161   :  { %v318_v27 = vsel %vm40_vm1, %v316_v24, %v312_v25 }
 0x162   :  { %323 = vrot.lane.b32.xlu1 %v318_v27, %s4993_s21 }
 0x164   :  { %v339_v2 = vpop.permute.xlu1 %338  ;;  %v345_v28 = vpop.permute.xlu0 %344 }
 0x165   :  { %v349_v29 = vsel %vm37_vm0, %v333_v26, %v339_v2  ;;  %v4446_v1 = vld [vmem:[#allocation2 + $0x8] sm:$0xf] }
 0x166   :  { %v351_v30 = vsel %vm40_vm1, %v349_v29, %v345_v28  ;;  %v901_v5 = vld [vmem:[#allocation2 + $0x8] sm:$0xf] }
 0x167   :  { %356 = vrot.lane.b32.xlu0 %v351_v30, %s4994_s22  ;;  %v1069_v6 = vld [vmem:[#allocation2 + $0x8] sm:$0xf] }
 0x168   :  { %v366_v31 = vpop.permute.xlu1 %365  ;;  %v372_v33 = vpop.permute.xlu0 %371  ;;  %v1238_v7 = vld [vmem:[#allocation2 + $0x8] sm:$0xf] }
 0x169   :  { %v382_v36 = vsel %vm37_vm0, %v366_v31, %v372_v33  ;;  %v1407_v8 = vld [vmem:[#allocation2 + $0x8] sm:$0xf] }
 0x16a   :  { %v1576_v10 = vld [vmem:[#allocation2 + $0x8] sm:$0xf] }
 0x16b   :  { %v1745_v11 = vld [vmem:[#allocation2 + $0x8] sm:$0xf] }
 0x16c   :  { %v465_v34 = vpop.permute.xlu1 %464  ;;  %v471_v35 = vpop.permute.xlu0 %470  ;;  %v1914_v13 = vld [vmem:[#allocation2 + $0x8] sm:$0xf] }
 0x16d   :  { %v481_v40 = vsel %vm37_vm0, %v465_v34, %v471_v35  ;;  %v4527_v35 = vld [vmem:[%s4956_s1 + $0x8] sm:$0xff] }
 0x170   :  { %v378_v37 = vpop.permute.xlu1 %377  ;;  %v399_v38 = vpop.permute.xlu0 %398 }
 0x171   :  { %v384_v39 = vsel %vm40_vm1, %v382_v36, %v378_v37 }
 0x172   :  { %389 = vrot.lane.b32.xlu1 %v384_v39, %s4995_s23  ;;  %v4542_v39 = vld [vmem:[%s4956_s1] sm:$0xff] }
 0x174   :  { %v405_v41 = vpop.permute.xlu1 %404  ;;  %v477_v42 = vpop.permute.xlu0 %476 }
 0x175   :  { %v483_v43 = vsel %vm40_vm1, %v481_v40, %v477_v42  ;;  %v415_v44 = vsel %vm37_vm0, %v399_v38, %v405_v41 }
 0x176   :  { %488 = vrot.lane.b32.xlu0 %v483_v43, %s4996_s24 }
 0x178   :  { %v411_v45 = vpop.permute.xlu1 %410  ;;  %v432_v46 = vpop.permute.xlu0 %431 }
 0x179   :  { %v417_v47 = vsel %vm40_vm1, %v415_v44, %v411_v45 }
 0x17a   :  { %422 = vrot.lane.b32.xlu1 %v417_v47, %s4997_s25 }
 0x17c   :  { %v438_v48 = vpop.permute.xlu1 %437  ;;  %v444_v49 = vpop.permute.xlu0 %443 }
 0x17d   :  { %v448_v50 = vsel %vm37_vm0, %v432_v46, %v438_v48  ;;  %v4566_v46 = vld [vmem:[%s4956_s1 + $0x10] sm:$0xff] }
 0x17e   :  { %v450_v51 = vsel %vm40_vm1, %v448_v50, %v444_v49 }
 0x17f   :  { %455 = vrot.lane.b32.xlu0 %v450_v51, %s4998_s26 }
 0x180   :  { %v505_v52 = vpop.permute.xlu1 %504  ;;  %v511_v53 = vpop.permute.xlu0 %510 }
 0x181   :  { %v521_v54 = vsel %vm37_vm0, %v505_v52, %v511_v53  ;;  %v4593_v52 = vld [vmem:[%s4956_s1 + $0x18] sm:$0xff] }
 0x184   :  { %v517_v55 = vpop.permute.xlu1 %516  ;;  %v538_v56 = vpop.permute.xlu0 %537 }
 0x185   :  { %v523_v57 = vsel %vm40_vm1, %v521_v54, %v517_v55 }
 0x186   :  { %528 = vrot.lane.b32.xlu1 %v523_v57, %s4999_s27 }
 0x188   :  { %v544_v59 = vpop.permute.xlu1 %543  ;;  %v550_v60 = vpop.permute.xlu0 %549 }
 0x189   :  { %v554_v63 = vsel %vm37_vm0, %v538_v56, %v544_v59  ;;  %vm4140_vm0 = vmmov 0  }
 0x18a   :  { %v556_v0 = vsel %vm40_vm1, %v554_v63, %v550_v60  ;;  %591 = vrot.lane.b32.xlu1 %v4439_v61, %s4097_s15  ;;  %3888 = vmatprep.mubr.msk.f32.mxu1 %vm4140_vm0, %v4135_v20  ;;  %vm5000_vm1 = vcmask 273536  }
 0x18b   :  { %561 = vrot.lane.b32.xlu0 %v556_v0, %s4136_s11  ;;  %v4627_v0 = vld [vmem:[%s4956_s1 + $0x28] sm:$0xff] }
 0x18d   :  { %v73_v3 = vpop.permute.xlu1 %72 }
 0x18e   :  { %78 = vst.msk [vmem:[#allocation2 + $0xc] sm:$0xf] %vm76_vm3, %v73_v3  ;;  %570 = vrot.lane.b32.xlu1 %v523_v57, %s4137_s12  ;;  %vm5001_vm3 = vcmask 421136   ;;  %v4605_v57 = vld [vmem:[%s4956_s1 + $0x20] sm:$0xff]  ;;  %v4143_v3 = vmov 0  }
 0x18f   :  { %593 = vrot.lane.b32.xlu0 %v4446_v1, %s4097_s15 }
 0x190   :  { %4068 = vset.pattern.permute.xlu0 %v4143_v3 }
 0x191   :  { %v84_v4 = vpop.permute.xlu0 %83 }
 0x192   :  { %89 = vst.msk [vmem:[#allocation2 + $0xc] sm:$0xf] %vm87_vm4, %v84_v4  ;;  %909 = vrot.lane.b32.xlu1 %v4439_v61, %s4125_s0  ;;  %vm5002_vm4 = vcmask 568736  }
 0x193   :  { %589 = vrot.lane.b32.xlu0 %v4434_v58, %s4097_s15 }
 0x196   :  { %907 = vrot.lane.b32.xlu1 %v4434_v58, %s4125_s0 }
 0x197   :  { %911 = vrot.lane.b32.xlu0 %v901_v5, %s4125_s0 }
 0x19a   :  { %1079 = vrot.lane.b32.xlu1 %v1069_v6, %s4138_s28 }
 0x19b   :  { %1077 = vrot.lane.b32.xlu0 %v4439_v61, %s4138_s28 }
 0x19e   :  { %1246 = vrot.lane.b32.xlu1 %v4439_v61, %s4139_s29 }
 0x19f   :  { %1075 = vrot.lane.b32.xlu0 %v4434_v58, %s4138_s28 }
 0x1a2   :  { %1244 = vrot.lane.b32.xlu1 %v4434_v58, %s4139_s29 }
 0x1a3   :  { %1248 = vrot.lane.b32.xlu0 %v1238_v7, %s4139_s29 }
 0x1a4   :  { %v117_v9 = vpop.permute.xlu1 %116 }
 0x1a5   :  { %122 = vst.msk [vmem:[#allocation2 + $0xc] sm:$0xf] %vm120_vm5, %v117_v9  ;;  %vm5003_vm5 = vcmask 716336  }
 0x1a6   :  { %1417 = vrot.lane.b32.xlu1 %v1407_v8, %s4991_s19 }
 0x1a7   :  { %1415 = vrot.lane.b32.xlu0 %v4439_v61, %s4991_s19 }
 0x1aa   :  { %1584 = vrot.lane.b32.xlu1 %v4439_v61, %s4141_s30 }
 0x1ab   :  { %1413 = vrot.lane.b32.xlu0 %v4434_v58, %s4991_s19 }
 0x1ae   :  { %1582 = vrot.lane.b32.xlu1 %v4434_v58, %s4141_s30 }
 0x1af   :  { %1586 = vrot.lane.b32.xlu0 %v1576_v10, %s4141_s30  ;;  %v4652_v10 = vld [vmem:[%s4956_s1 + $0x30] sm:$0xff] }
 0x1b0   :  { %v150_v12 = vpop.permute.xlu0 %149 }
 0x1b1   :  { %155 = vst.msk [vmem:[#allocation2 + $0xc] sm:$0xf] %vm153_vm6, %v150_v12  ;;  %vm5004_vm6 = vcmask 1014784  }
 0x1b2   :  { %1755 = vrot.lane.b32.xlu1 %v1745_v11, %s4142_s4 }
 0x1b3   :  { %1753 = vrot.lane.b32.xlu0 %v4439_v61, %s4142_s4 }
 0x1b6   :  { %1922 = vrot.lane.b32.xlu1 %v4439_v61, %s4990_s18 }
 0x1b7   :  { %1751 = vrot.lane.b32.xlu0 %v4434_v58, %s4142_s4 }
 0x1b8   :  { %v249_v14 = vpop.permute.xlu1 %248 }
 0x1b9   :  { %v251_v16 = vrot.slane %v249_v14, 4 }
 0x1ba   :  { %1920 = vrot.lane.b32.xlu1 %v4434_v58, %s4990_s18 }
 0x1bb   :  { %1924 = vrot.lane.b32.xlu0 %v1914_v13, %s4990_s18  ;;  %v254_v18 = vsel %vm252_vm10, %v251_v16, %v249_v14  ;;  %v4664_v13 = vld [vmem:[%s4956_s1 + $0x38] sm:$0xff] }
 0x1bc   :  { %v183_v15 = vpop.permute.xlu0 %182 }
 0x1bd   :  { %188 = vst.msk [vmem:[#allocation2 + $0xc] sm:$0xf] %vm186_vm7, %v183_v15  ;;  %vm5005_vm7 = vcmask 1011536  }
 0x1c1   :  { %v216_v17 = vpop.permute.xlu1 %215 }
 0x1c2   :  { %221 = vst.msk [vmem:[#allocation2 + $0xc] sm:$0xf] %vm219_vm11, %v216_v17  ;;  %vm595_vm11 = vcmask 1039360  }
 0x1c3   :  { %261 = vst.msk [vmem:[#allocation2 + $0xc] sm:$0xff] %vm4359_vm12, %v254_v18  ;;  %vm602_vm12 = vcmask 1043456  }
 0x1cc   :  { %v289_v19 = vpop.permute.xlu0 %288 }
 0x1cd   :  { %294 = vst.msk [vmem:[#allocation2 + $0x10] sm:$0xf] %vm5000_vm1, %v289_v19  ;;  %v4689_v19 = vld [vmem:[%s4956_s1 + $0x40] sm:$0xff]  ;;  %vm1926_vm1 = vcmask 736256  }
 0x1d4   :  { %v324_v21 = vpop.permute.xlu1 %323 }
 0x1d5   :  { %329 = vst.msk [vmem:[#allocation2 + $0x10] sm:$0xf] %vm5001_vm3, %v324_v21  ;;  %vm2150_vm3 = vcmask 392192  }
 0x1d9   :  { %v357_v22 = vpop.permute.xlu0 %356 }
 0x1da   :  { %362 = vst.msk [vmem:[#allocation2 + $0x10] sm:$0xf] %vm5002_vm4, %v357_v22  ;;  %vm2140_vm4 = vcmask 818176  }
 0x1e4   :  { %v390_v23 = vpop.permute.xlu1 %389 }
 0x1e5   :  { %395 = vst.msk [vmem:[#allocation2 + $0x10] sm:$0xf] %vm5003_vm5, %v390_v23  ;;  %v580_v23 = vld [vmem:[%s4957_s2] sm:$0xff]  ;;  %s4144_s2 = smov 100   ;;  %vm2152_vm5 = vcmask 523264  }
 0x1e8   :  { %v489_v24 = vpop.permute.xlu0 %488 }
 0x1e9   :  { %v491_v26 = vrot.slane %v489_v24, 4 }
 0x1eb   :  { %v494_v32 = vsel %vm5004_vm6, %v491_v26, %v489_v24  ;;  %vm2154_vm6 = vcmask 654336  }
 0x1ec   :  { %v423_v25 = vpop.permute.xlu1 %422 }
 0x1ed   :  { %428 = vst.msk [vmem:[#allocation2 + $0x10] sm:$0xf] %vm426_vm2, %v423_v25  ;;  %vm1419_vm2 = vcmask 883712  }
 0x1f1   :  { %v456_v27 = vpop.permute.xlu0 %455 }
 0x1f2   :  { %461 = vst.msk [vmem:[#allocation2 + $0x10] sm:$0xf] %vm5005_vm7, %v456_v27  ;;  %vm2156_vm7 = vcmask 785408  }
 0x1f3   :  { %501 = vst.msk [vmem:[#allocation2 + $0x10] sm:$0xff] %vm4389_vm13, %v494_v32  ;;  %vm598_vm13 = vcmask 31744  }
 0x1f8   :  { %v529_v2 = vpop.permute.xlu1 %528 }
 0x1f9   :  { %534 = vst.msk [vmem:[#allocation2 + $0x14] sm:$0xf] %vm532_vm8, %v529_v2  ;;  %vm1588_vm8 = vcmask 752640  }
 0x1fa   :  { %v4509_v28 = vld [vmem:[#allocation2 + $0xc] sm:$0xff] }
 0x1fb   :  { %v4513_v29 = vcombine.high %v4509_v28, %v4509_v28 }
 0x1fc   :  { %v592_v30 = vpop.permute.xlu1 %591 }
 0x1fd   :  { %2179 = vrot.lane.b32.xlu0 %v4513_v29, %s4097_s15  ;;  %v562_v31 = vpop.permute.xlu0 %561 }
 0x1fe   :  { %567 = vst.msk [vmem:[#allocation2 + $0x14] sm:$0xf] %vm565_vm9, %v562_v31  ;;  %vm1757_vm9 = vcmask 744448  }
 0x200   :  { %v571_v33 = vpop.permute.xlu1 %570 }
 0x201   :  { %576 = vst.msk [vmem:[#allocation2 + $0x14] sm:$0xf] %vm574_vm14, %v571_v33  ;;  %2177 = vrot.lane.b32.xlu0 %v4509_v28, %s4097_s15  ;;  %v594_v62 = vpop.permute.xlu0 %593  ;;  %vm1081_vm14 = vcmask 900096  }
 0x202   :  { %579 = vst.msk [vmem:[#allocation2 + $0x14] sm:$0xf] %vm577_vm15, %v4135_v20  ;;  %v597_v34 = vsel %vm595_vm11, %v592_v30, %v594_v62  ;;  %3887 = vmatpush3.msk.msra.mxu1 %vm602_vm12, %v594_v62  ;;  %vm1250_vm15 = vcmask 891904  }
 0x203   :  { %3745 = vmatprep.subr.msk.mxu0 %vm602_vm12, %v597_v34  ;;  %3889 = vmatmul.mubr.msk.f32.vlgmr.msra.gmra.mrb[0].mxu1 %vm598_vm13, %v4527_v35 }
 0x204   :  { %v910_v36 = vpop.permute.xlu1 %909  ;;  %3891 = vmatprep.subr.mxu1 %v4135_v20  ;;  %3893 = vmatprep.mubr.msk.f32.mxu1 %vm4140_vm0, %v4135_v20 }
 0x205   :  { %v590_v37 = vpop.permute.xlu0 %589  ;;  %3892 = vmatpush3.msk.msra.mxu1 %vm602_vm12, %v4446_v1 }
 0x206   :  { %v596_v38 = vsel %vm595_vm11, %v590_v37, %v592_v30  ;;  %3896 = vmatprep.subr.mxu1 %v4135_v20 }
 0x207   :  { %3746 = vmatpush1.msk.msra.mxu0 %vm602_vm12, %v596_v38  ;;  %3894 = vmatmul.mubr.msk.f32.vlgmr.msra.gmra.mrb[2].mxu1 %vm598_vm13, %v4542_v39 }
 0x208   :  { %v908_v40 = vpop.permute.xlu1 %907  ;;  %3747 = vmatmul.mubr.msk.f32.vlgmr.msra.gmra.mrb[0].mxu0 %vm598_vm13, %v4527_v35  ;;  %3750 = vmatprep.subr.msk.mxu0 %vm602_vm12, %v4439_v61 }
 0x209   :  { %3751 = vmatpush1.msk.msra.mxu0 %vm602_vm12, %v4434_v58  ;;  %v912_v41 = vpop.permute.xlu0 %911  ;;  %v2486_v42 = vld [vmem:[#allocation2 + $0x14] sm:$0xf]  ;;  %823 = vmatprep.mubr.f32.mxu0 %v4135_v20  ;;  %v913_v48 = vsel %vm252_vm10, %v908_v40, %v910_v36 }
 0x20a   :  { %v4554_v43 = vld [vmem:[#allocation2 + $0x14] sm:$0xf]  ;;  %v914_v44 = vsel %vm252_vm10, %v910_v36, %v912_v41  ;;  %2495 = vrot.lane.b32.xlu0 %v2486_v42, %s4125_s0  ;;  %3897 = vmatpush3.msk.msra.mxu1 %vm602_vm12, %v912_v41 }
 0x20b   :  { %2181 = vrot.lane.b32.xlu1 %v4554_v43, %s4097_s15  ;;  %3756 = vmatprep.subr.msk.mxu0 %vm602_vm12, %v914_v44  ;;  %v2820_v53 = vld [vmem:[#allocation2 + $0x14] sm:$0xf] }
 0x20c   :  { %v1080_v45 = vpop.permute.xlu1 %1079  ;;  %3898 = vmatprep.mubr.msk.f32.mxu1 %vm4140_vm0, %v4135_v20  ;;  %3901 = vmatprep.subr.mxu1 %v4135_v20  ;;  %v2653_v55 = vld [vmem:[#allocation2 + $0x14] sm:$0xf] }
 0x20d   :  { %v1078_v47 = vpop.permute.xlu0 %1077  ;;  %3899 = vmatmul.mubr.msk.f32.vlgmr.msra.gmra.mrb[4].mxu1 %vm598_vm13, %v4566_v46  ;;  %v3154_v4 = vld [vmem:[#allocation2 + $0x14] sm:$0xf] }
 0x20e   :  { %2660 = vrot.lane.b32.xlu0 %v4513_v29, %s4138_s28  ;;  %3902 = vmatpush3.msk.msra.mxu1 %vm602_vm12, %v1080_v45  ;;  %v1083_v50 = vsel %vm1081_vm14, %v1078_v47, %v1080_v45  ;;  %v2987_v7 = vld [vmem:[#allocation2 + $0x14] sm:$0xf] }
 0x20f   :  { %2493 = vrot.lane.b32.xlu1 %v4513_v29, %s4125_s0  ;;  %3903 = vmatprep.mubr.msk.f32.mxu1 %vm4140_vm0, %v4135_v20  ;;  %v3488_v17 = vld [vmem:[#allocation2 + $0x14] sm:$0xf] }
 0x210   :  { %v1247_v49 = vpop.permute.xlu1 %1246  ;;  %3752 = vmatmul.mubr.msk.f32.vlgmr.msra.gmra.mrb[0].mxu0 %vm598_vm13, %v4542_v39  ;;  %3906 = vmatprep.subr.mxu1 %v4135_v20  ;;  %v3321_v18 = vld [vmem:[#allocation2 + $0x14] sm:$0xf] }
 0x211   :  { %3757 = vmatpush1.msk.msra.mxu0 %vm602_vm12, %v913_v48  ;;  %v1076_v51 = vpop.permute.xlu0 %1075  ;;  %988 = vmatprep.mubr.f32.mxu0 %v4135_v20 }
 0x212   :  { %3762 = vmatprep.subr.msk.mxu0 %vm602_vm12, %v1083_v50  ;;  %2658 = vrot.lane.b32.xlu0 %v4509_v28, %s4138_s28  ;;  %v1082_v58 = vsel %vm1081_vm14, %v1076_v51, %v1078_v47 }
 0x213   :  { %2491 = vrot.lane.b32.xlu1 %v4509_v28, %s4125_s0  ;;  %3904 = vmatmul.mubr.msk.f32.vlgmr.msra.gmra.mrb[6].mxu1 %vm598_vm13, %v4593_v52 }
 0x214   :  { %v1245_v54 = vpop.permute.xlu1 %1244  ;;  %3908 = vmatprep.mubr.msk.f32.mxu1 %vm4140_vm0, %v4135_v20 }
 0x215   :  { %v1249_v56 = vpop.permute.xlu0 %1248  ;;  %v1251_v5 = vsel %vm1250_vm15, %v1245_v54, %v1247_v49 }
 0x216   :  { %2829 = vrot.lane.b32.xlu0 %v2820_v53, %s4139_s29  ;;  %3907 = vmatpush3.msk.msra.mxu1 %vm602_vm12, %v1249_v56  ;;  %v1252_v60 = vsel %vm1250_vm15, %v1247_v49, %v1249_v56 }
 0x217   :  { %2662 = vrot.lane.b32.xlu1 %v2653_v55, %s4138_s28  ;;  %3909 = vmatmul.mubr.msk.f32.vlgmr.msra.gmra.mrb[8].mxu1 %vm598_vm13, %v4605_v57 }
 0x218   :  { %v1418_v59 = vpop.permute.xlu1 %1417  ;;  %3758 = vmatmul.mubr.msk.f32.vlgmr.msra.gmra.mrb[0].mxu0 %vm598_vm13, %v4566_v46  ;;  %3911 = vmatprep.subr.mxu1 %v4135_v20 }
 0x219   :  { %3763 = vmatpush1.msk.msra.mxu0 %vm602_vm12, %v1082_v58  ;;  %v1416_v61 = vpop.permute.xlu0 %1415  ;;  %1157 = vmatprep.mubr.f32.mxu0 %v4135_v20 }
 0x21a   :  { %3768 = vmatprep.subr.msk.mxu0 %vm602_vm12, %v1252_v60  ;;  %2994 = vrot.lane.b32.xlu0 %v4513_v29, %s4991_s19  ;;  %v1421_v8 = vsel %vm1419_vm2, %v1416_v61, %v1418_v59 }
 0x21b   :  { %2827 = vrot.lane.b32.xlu1 %v4513_v29, %s4139_s29  ;;  %3912 = vmatpush3.msk.msra.mxu1 %vm602_vm12, %v1418_v59 }
 0x21c   :  { %v1585_v63 = vpop.permute.xlu1 %1584  ;;  %3913 = vmatprep.mubr.msk.f32.mxu1 %vm4140_vm0, %v4135_v20  ;;  %3916 = vmatprep.subr.mxu1 %v4135_v20 }
 0x21d   :  { %v1414_v1 = vpop.permute.xlu0 %1413  ;;  %3914 = vmatmul.mubr.msk.f32.vlgmr.msra.gmra.mrb[10].mxu1 %vm598_vm13, %v4627_v0 }
 0x21e   :  { %2992 = vrot.lane.b32.xlu0 %v4509_v28, %s4991_s19  ;;  %3918 = vmatprep.mubr.msk.f32.mxu1 %vm4140_vm0, %v4135_v20  ;;  %v1420_v14 = vsel %vm1419_vm2, %v1414_v1, %v1416_v61 }
 0x21f   :  { %2825 = vrot.lane.b32.xlu1 %v4509_v28, %s4139_s29 }
 0x220   :  { %v1583_v6 = vpop.permute.xlu1 %1582  ;;  %3764 = vmatmul.mubr.msk.f32.vlgmr.msra.gmra.mrb[0].mxu0 %vm598_vm13, %v4593_v52 }
 0x221   :  { %3769 = vmatpush1.msk.msra.mxu0 %vm602_vm12, %v1251_v5  ;;  %v1587_v9 = vpop.permute.xlu0 %1586  ;;  %1326 = vmatprep.mubr.f32.mxu0 %v4135_v20  ;;  %v1589_v22 = vsel %vm1588_vm8, %v1583_v6, %v1585_v63 }
 0x222   :  { %3774 = vmatprep.subr.msk.mxu0 %vm602_vm12, %v1421_v8  ;;  %3163 = vrot.lane.b32.xlu0 %v3154_v4, %s4141_s30  ;;  %v1590_v15 = vsel %vm1588_vm8, %v1585_v63, %v1587_v9 }
 0x223   :  { %2996 = vrot.lane.b32.xlu1 %v2987_v7, %s4991_s19  ;;  %3917 = vmatpush3.msk.msra.mxu1 %vm602_vm12, %v1587_v9 }
 0x224   :  { %v1756_v11 = vpop.permute.xlu1 %1755  ;;  %3919 = vmatmul.mubr.msk.f32.vlgmr.msra.gmra.mrb[12].mxu1 %vm598_vm13, %v4652_v10  ;;  %3921 = vmatprep.subr.mxu1 %v4135_v20 }
 0x225   :  { %v1754_v12 = vpop.permute.xlu0 %1753  ;;  %3922 = vmatpush3.msk.msra.mxu1 %vm602_vm12, %v1756_v11  ;;  %3923 = vmatprep.mubr.msk.f32.mxu1 %vm4140_vm0, %v4135_v20 }
 0x226   :  { %3328 = vrot.lane.b32.xlu0 %v4513_v29, %s4142_s4  ;;  %3926 = vmatprep.subr.mxu1 %v4135_v20  ;;  %v1759_v24 = vsel %vm1757_vm9, %v1754_v12, %v1756_v11 }
 0x227   :  { %3161 = vrot.lane.b32.xlu1 %v4513_v29, %s4141_s30 }
 0x228   :  { %3770 = vmatmul.mubr.msk.f32.vlgmr.msra.gmra.mrb[0].mxu0 %vm598_vm13, %v4605_v57  ;;  %3924 = vmatmul.mubr.msk.f32.vlgmr.msra.gmra.mrb[14].mxu1 %vm598_vm13, %v4664_v13  ;;  %v1923_v25 = vpop.permute.xlu1 %1922 }
 0x229   :  { %3775 = vmatpush1.msk.msra.mxu0 %vm602_vm12, %v1420_v14  ;;  %v1752_v16 = vpop.permute.xlu0 %1751  ;;  %1495 = vmatprep.mubr.f32.mxu0 %v4135_v20 }
 0x22a   :  { %3780 = vmatprep.subr.msk.mxu0 %vm602_vm12, %v1590_v15  ;;  %3326 = vrot.lane.b32.xlu0 %v4509_v28, %s4142_s4  ;;  %v1758_v26 = vsel %vm1757_vm9, %v1752_v16, %v1754_v12 }
 0x22b   :  { %3159 = vrot.lane.b32.xlu1 %v4509_v28, %s4141_s30  ;;  %3928 = vmatprep.mubr.msk.f32.mxu1 %vm4140_vm0, %v4135_v20  ;;  %s4146_s30 = smov 114  }
 0x22c   :  { %v1921_v32 = vpop.permute.xlu1 %1920 }
 0x22d   :  { %v1925_v21 = vpop.permute.xlu0 %1924  ;;  %v1927_v2 = vsel %vm1926_vm1, %v1921_v32, %v1923_v25 }
 0x22e   :  { %3497 = vrot.lane.b32.xlu0 %v3488_v17, %s4990_s18  ;;  %3927 = vmatpush3.msk.msra.mxu1 %vm602_vm12, %v1925_v21  ;;  %v1928_v27 = vsel %vm1926_vm1, %v1923_v25, %v1925_v21 }
 0x22f   :  { %3330 = vrot.lane.b32.xlu1 %v3321_v18, %s4142_s4  ;;  %3929 = vmatmul.mubr.msk.f32.vlgmr.msra.gmra.mrb[16].mxu1 %vm598_vm13, %v4689_v19  ;;  %s4147_s4 = smov 120  }
 0x230   :  { %3776 = vmatmul.mubr.msk.f32.vlgmr.msra.gmra.mrb[0].mxu0 %vm598_vm13, %v4627_v0  ;;  %3931 = vmatprep.subr.mxu1 %v4135_v20 }
 0x231   :  { %3781 = vmatpush1.msk.msra.mxu0 %vm602_vm12, %v1589_v22  ;;  %1664 = vmatprep.mubr.f32.mxu0 %v4135_v20 }
 0x232   :  { %3786 = vmatprep.subr.msk.mxu0 %vm602_vm12, %v1759_v24  ;;  %3933 = vmatprep.mubr.msk.f32.mxu1 %vm4140_vm0, %v4135_v20 }
 0x233   :  { %3495 = vrot.lane.b32.xlu1 %v4513_v29, %s4990_s18  ;;  %2084 = vperm.xlu0 %4068, %v580_v23  }
 0x237   :  { %3493 = vrot.lane.b32.xlu1 %v4509_v28, %s4990_s18  ;;  %s4145_s18 = smov 122  }
 0x238   :  { %3782 = vmatmul.mubr.msk.f32.vlgmr.msra.gmra.mrb[0].mxu0 %vm598_vm13, %v4652_v10 }
 0x239   :  { %3787 = vmatpush1.msk.msra.mxu0 %vm602_vm12, %v1758_v26  ;;  %1833 = vmatprep.mubr.f32.mxu0 %v4135_v20 }
 0x23a   :  { %3792 = vmatprep.subr.msk.mxu0 %vm602_vm12, %v1928_v27 }
 0x240   :  { %3788 = vmatmul.mubr.msk.f32.vlgmr.msra.gmra.mrb[0].mxu0 %vm598_vm13, %v4664_v13 }
 0x241   :  { %3793 = vmatpush1.msk.msra.mxu0 %vm602_vm12, %v1927_v2  ;;  %2002 = vmatprep.mubr.f32.mxu0 %v4135_v20 }
 0x248   :  { %3794 = vmatmul.mubr.msk.f32.vlgmr.msra.gmra.mrb[0].mxu0 %vm598_vm13, %v4689_v19 }
 0x249   :  { %2258 = vmatprep.mubr.f32.mxu0 %v4135_v20 }
 0x26f   :  { %v2180_v30 = vpop.permute.xlu0 %2179 }
 0x273   :  { %v2178_v31 = vpop.permute.xlu0 %2177 }
 0x274   :  { %v2183_v36 = vsel %vm595_vm11, %v2178_v31, %v2180_v30 }
 0x27c   :  { %v2496_v62 = vpop.permute.xlu0 %2495 }
 0x27d   :  { %v2182_v33 = vpop.permute.xlu1 %2181 }
 0x27e   :  { %v2184_v34 = vsel %vm595_vm11, %v2180_v30, %v2182_v33  ;;  %3932 = vmatpush3.msk.msra.mxu1 %vm602_vm12, %v2182_v33  ;;  %vm2114_vm11 = vcmask 932864  }
 0x27f   :  { %3798 = vmatprep.subr.msk.mxu0 %vm602_vm12, %v2184_v34  ;;  %3934 = vmatmul.mubr.msk.f32.vlgmr.msra.gmra.mrb[18].mxu1 %vm598_vm13, %v4527_v35 }
 0x280   :  { %3799 = vmatpush1.msk.msra.mxu0 %vm602_vm12, %v2183_v36  ;;  %3936 = vmatprep.subr.mxu1 %v4135_v20  ;;  %v2661_v38 = vpop.permute.xlu0 %2660 }
 0x281   :  { %v2494_v37 = vpop.permute.xlu1 %2493  ;;  %3800 = vmatmul.mubr.msk.f32.vlgmr.msra.gmra.mrb[2].mxu0 %vm598_vm13, %v4527_v35  ;;  %3803 = vmatprep.subr.msk.mxu0 %vm602_vm12, %v4513_v29 }
 0x282   :  { %v2498_v40 = vsel %vm252_vm10, %v2494_v37, %v2496_v62  ;;  %3804 = vmatpush1.msk.msra.mxu0 %vm602_vm12, %v4509_v28  ;;  %2408 = vmatprep.mubr.f32.mxu0 %v4135_v20 }
 0x283   :  { %3809 = vmatprep.subr.msk.mxu0 %vm602_vm12, %v2498_v40  ;;  %3937 = vmatpush3.msk.msra.mxu1 %vm602_vm12, %v4554_v43 }
 0x284   :  { %3938 = vmatprep.mubr.msk.f32.mxu1 %vm4140_vm0, %v4135_v20  ;;  %3941 = vmatprep.subr.mxu1 %v4135_v20  ;;  %v2659_v35 = vpop.permute.xlu0 %2658 }
 0x285   :  { %3939 = vmatmul.mubr.msk.f32.vlgmr.msra.gmra.mrb[20].mxu1 %vm598_vm13, %v4542_v39  ;;  %v2492_v29 = vpop.permute.xlu1 %2491  ;;  %v2664_v45 = vsel %vm1081_vm14, %v2659_v35, %v2661_v38 }
 0x286   :  { %3942 = vmatpush3.msk.msra.mxu1 %vm602_vm12, %v2496_v62  ;;  %3943 = vmatprep.mubr.msk.f32.mxu1 %vm4140_vm0, %v4135_v20  ;;  %v2497_v28 = vsel %vm252_vm10, %v2492_v29, %v2494_v37  ;;  %vm2146_vm10 = vcmask 130048  }
 0x287   :  { %3946 = vmatprep.subr.mxu1 %v4135_v20 }
 0x288   :  { %v2830_v41 = vpop.permute.xlu0 %2829 }
 0x289   :  { %3805 = vmatmul.mubr.msk.f32.vlgmr.msra.gmra.mrb[2].mxu0 %vm598_vm13, %v4542_v39  ;;  %3944 = vmatmul.mubr.msk.f32.vlgmr.msra.gmra.mrb[22].mxu1 %vm598_vm13, %v4566_v46  ;;  %v2663_v42 = vpop.permute.xlu1 %2662 }
 0x28a   :  { %3810 = vmatpush1.msk.msra.mxu0 %vm602_vm12, %v2497_v28  ;;  %2572 = vmatprep.mubr.f32.mxu0 %v4135_v20  ;;  %v2665_v43 = vsel %vm1081_vm14, %v2661_v38, %v2663_v42 }
 0x28b   :  { %3947 = vmatpush3.msk.msra.mxu1 %vm602_vm12, %v2663_v42  ;;  %3948 = vmatprep.mubr.msk.f32.mxu1 %vm4140_vm0, %v4135_v20 }
 0x28c   :  { %3815 = vmatprep.subr.msk.mxu0 %vm602_vm12, %v2665_v43  ;;  %3951 = vmatprep.subr.mxu1 %v4135_v20  ;;  %v2995_v39 = vpop.permute.xlu0 %2994 }
 0x28d   :  { %3949 = vmatmul.mubr.msk.f32.vlgmr.msra.gmra.mrb[24].mxu1 %vm598_vm13, %v4593_v52  ;;  %v2828_v44 = vpop.permute.xlu1 %2827 }
 0x28e   :  { %3952 = vmatpush3.msk.msra.mxu1 %vm602_vm12, %v2830_v41  ;;  %3953 = vmatprep.mubr.msk.f32.mxu1 %vm4140_vm0, %v4135_v20  ;;  %v2832_v48 = vsel %vm1250_vm15, %v2828_v44, %v2830_v41 }
 0x28f   :  { %3956 = vmatprep.subr.mxu1 %v4135_v20 }
 0x290   :  { %v2993_v47 = vpop.permute.xlu0 %2992 }
 0x291   :  { %3811 = vmatmul.mubr.msk.f32.vlgmr.msra.gmra.mrb[2].mxu0 %vm598_vm13, %v4566_v46  ;;  %3954 = vmatmul.mubr.msk.f32.vlgmr.msra.gmra.mrb[26].mxu1 %vm598_vm13, %v4605_v57  ;;  %v2826_v49 = vpop.permute.xlu1 %2825  ;;  %v2998_v58 = vsel %vm1419_vm2, %v2993_v47, %v2995_v39 }
 0x292   :  { %3816 = vmatpush1.msk.msra.mxu0 %vm602_vm12, %v2664_v45  ;;  %2739 = vmatprep.mubr.f32.mxu0 %v4135_v20  ;;  %v2831_v46 = vsel %vm1250_vm15, %v2826_v49, %v2828_v44 }
 0x293   :  { %3821 = vmatprep.subr.msk.mxu0 %vm602_vm12, %v2832_v48  ;;  %3958 = vmatprep.mubr.msk.f32.mxu1 %vm4140_vm0, %v4135_v20 }
 0x294   :  { %v3164_v50 = vpop.permute.xlu0 %3163 }
 0x295   :  { %v2997_v51 = vpop.permute.xlu1 %2996 }
 0x296   :  { %3957 = vmatpush3.msk.msra.mxu1 %vm602_vm12, %v2997_v51  ;;  %v2999_v54 = vsel %vm1419_vm2, %v2995_v39, %v2997_v51 }
 0x297   :  { %3959 = vmatmul.mubr.msk.f32.vlgmr.msra.gmra.mrb[28].mxu1 %vm598_vm13, %v4627_v0  ;;  %3961 = vmatprep.subr.mxu1 %v4135_v20 }
 0x298   :  { %v3329_v53 = vpop.permute.xlu0 %3328  ;;  %3962 = vmatpush3.msk.msra.mxu1 %vm602_vm12, %v3164_v50  ;;  %3963 = vmatprep.mubr.msk.f32.mxu1 %vm4140_vm0, %v4135_v20 }
 0x299   :  { %3817 = vmatmul.mubr.msk.f32.vlgmr.msra.gmra.mrb[2].mxu0 %vm598_vm13, %v4593_v52  ;;  %v3162_v55 = vpop.permute.xlu1 %3161  ;;  %3966 = vmatprep.subr.mxu1 %v4135_v20 }
 0x29a   :  { %3822 = vmatpush1.msk.msra.mxu0 %vm602_vm12, %v2831_v46  ;;  %2906 = vmatprep.mubr.f32.mxu0 %v4135_v20  ;;  %v3166_v59 = vsel %vm1588_vm8, %v3162_v55, %v3164_v50 }
 0x29b   :  { %3827 = vmatprep.subr.msk.mxu0 %vm602_vm12, %v2999_v54  ;;  %3964 = vmatmul.mubr.msk.f32.vlgmr.msra.gmra.mrb[30].mxu1 %vm598_vm13, %v4652_v10 }
 0x29c   :  { %3968 = vmatprep.mubr.msk.f32.mxu1 %vm4140_vm0, %v4135_v20  ;;  %v3327_v56 = vpop.permute.xlu0 %3326 }
 0x29d   :  { %v3160_v52 = vpop.permute.xlu1 %3159  ;;  %v3332_v3 = vsel %vm1757_vm9, %v3327_v56, %v3329_v53 }
 0x2a0   :  { %v3498_v61 = vpop.permute.xlu0 %3497 }
 0x2a1   :  { %3823 = vmatmul.mubr.msk.f32.vlgmr.msra.gmra.mrb[2].mxu0 %vm598_vm13, %v4605_v57  ;;  %v3331_v60 = vpop.permute.xlu1 %3330  ;;  %v3165_v57 = vsel %vm1588_vm8, %v3160_v52, %v3162_v55 }
 0x2a2   :  { %3828 = vmatpush1.msk.msra.mxu0 %vm602_vm12, %v2998_v58  ;;  %3073 = vmatprep.mubr.f32.mxu0 %v4135_v20  ;;  %v3333_v63 = vsel %vm1757_vm9, %v3329_v53, %v3331_v60 }
 0x2a3   :  { %3833 = vmatprep.subr.msk.mxu0 %vm602_vm12, %v3166_v59  ;;  %3967 = vmatpush3.msk.msra.mxu1 %vm602_vm12, %v3331_v60 }
 0x2a4   :  { %3969 = vmatmul.mubr.msk.f32.vlgmr.msra.gmra.mrb[32].mxu1 %vm598_vm13, %v4664_v13  ;;  %3971 = vmatprep.subr.mxu1 %v4135_v20 }
 0x2a5   :  { %3972 = vmatpush3.msk.msra.mxu1 %vm602_vm12, %v3498_v61  ;;  %3973 = vmatprep.mubr.msk.f32.mxu1 %vm4140_vm0, %v4135_v20  ;;  %v3496_v1 = vpop.permute.xlu1 %3495  ;;  %vm2148_vm0 = vcmask 261120  }
 0x2a6   :  { %v3500_v4 = vsel %vm1926_vm1, %v3496_v1, %v3498_v61 }
 0x2a8   :  { %3974 = vmatmul.mubr.msk.f32.vlgmr.msra.gmra.mrb[34].mxu1 %vm598_vm13, %v4689_v19 }
 0x2a9   :  { %3829 = vmatmul.mubr.msk.f32.vlgmr.msra.gmra.mrb[2].mxu0 %vm598_vm13, %v4627_v0  ;;  %v3494_v0 = vpop.permute.xlu1 %3493 }
 0x2aa   :  { %3834 = vmatpush1.msk.msra.mxu0 %vm602_vm12, %v3165_v57  ;;  %3240 = vmatprep.mubr.f32.mxu0 %v4135_v20  ;;  %v3499_v5 = vsel %vm1926_vm1, %v3494_v0, %v3496_v1 }
 0x2ab   :  { %3839 = vmatprep.subr.msk.mxu0 %vm602_vm12, %v3333_v63 }
 0x2b1   :  { %3835 = vmatmul.mubr.msk.f32.vlgmr.msra.gmra.mrb[2].mxu0 %vm598_vm13, %v4652_v10 }
 0x2b2   :  { %3840 = vmatpush1.msk.msra.mxu0 %vm602_vm12, %v3332_v3  ;;  %3407 = vmatprep.mubr.f32.mxu0 %v4135_v20  ;;  %v4842_v30 = vpop.permute.xlu0 %2084 }
 0x2b3   :  { %3845 = vmatprep.subr.msk.mxu0 %vm602_vm12, %v3500_v4 }
 0x2b9   :  { %3841 = vmatmul.mubr.msk.f32.vlgmr.msra.gmra.mrb[2].mxu0 %vm598_vm13, %v4664_v13 }
 0x2ba   :  { %3846 = vmatpush1.msk.msra.mxu0 %vm602_vm12, %v3499_v5  ;;  %3574 = vmatprep.mubr.f32.mxu0 %v4135_v20  ;;  %vm2158_vm12 = vcmask 916480  }
 0x2c1   :  { %3847 = vmatmul.mubr.msk.f32.vlgmr.msra.gmra.mrb[2].mxu0 %vm598_vm13, %v4689_v19 }
 0x2d6   :  { %v746_v6 = vpop.f32.mrb[0].mxu1 }
 0x2d7   :  { %v3890_v7 = vpop.f32.mrb[1].mxu1 }
 0x2da   :  { %v896_v8 = vpop.f32.mrb[2].mxu1 }
 0x2db   :  { %v897_v9 = vadd.f32 %v896_v8, %v746_v6  ;;  %v3895_v10 = vpop.f32.mrb[3].mxu1 }
 0x2e0   :  { %v1061_v11 = vpop.f32.mrb[4].mxu1 }
 0x2e1   :  { %v1067_v12 = vadd.f32 %v1061_v11, %v897_v9  ;;  %v3900_v14 = vpop.f32.mrb[5].mxu1 }
 0x2e6   :  { %v1230_v15 = vpop.f32.mrb[6].mxu1 }
 0x2e7   :  { %v1236_v16 = vadd.f32 %v1230_v15, %v1067_v12  ;;  %v3905_v17 = vpop.f32.mrb[7].mxu1 }
 0x2ea   :  { %v1399_v18 = vpop.f32.mrb[8].mxu1 }
 0x2eb   :  { %v1405_v13 = vadd.f32 %v1399_v18, %v1236_v16  ;;  %v3910_v21 = vpop.f32.mrb[9].mxu1 }
 0x2f0   :  { %v1568_v22 = vpop.f32.mrb[10].mxu1 }
 0x2f1   :  { %v1574_v23 = vadd.f32 %v1568_v22, %v1405_v13  ;;  %v3915_v20 = vpop.f32.mrb[11].mxu1 }
 0x2f7   :  { %v1737_v24 = vpop.f32.mrb[12].mxu1 }
 0x2f8   :  { %v1743_v25 = vadd.f32 %v1737_v24, %v1574_v23  ;;  %v3920_v19 = vpop.f32.mrb[13].mxu1 }
 0x2fb   :  { %v1906_v26 = vpop.f32.mrb[14].mxu1 }
 0x2fc   :  { %v1912_v27 = vadd.f32 %v1906_v26, %v1743_v25  ;;  %v3925_v32 = vpop.f32.mrb[15].mxu1 }
 0x302   :  { %v2075_v2 = vpop.f32.mrb[16].mxu1 }
 0x303   :  { %v2081_v31 = vadd.f32 %v2075_v2, %v1912_v27  ;;  %v3930_v33 = vpop.f32.mrb[17].mxu1 }
 0x305   :  { %v4845_v62 = vadd.f32 %v4842_v30, %v2081_v31 }
 0x307   :  { %2138 = vrot.lane.b32.xlu1 %v4845_v62, %s4144_s2 }
 0x31b   :  { %v2004_v34 = vpop.f32.mrb[0].mxu0 }
 0x31c   :  { %v4850_v36 = vadd.f32 %v4842_v30, %v2004_v34  ;;  %v2006_v37 = vpop.f32.mrb[1].mxu0 }
 0x31d   :  { %v2088_v38 = vadd.f32 %v4842_v30, %v2006_v37 }
 0x31e   :  { %2094 = vrot.lane.b32.xlu0 %v4850_v36, %s4996_s24  ;;  %2091 = vrot.lane.b32.xlu1 %v4850_v36, %s4125_s0 }
 0x322   :  { %2097 = vrot.lane.b32.xlu0 %v4850_v36, %s4145_s18  ;;  %2110 = vrot.lane.b32.xlu1 %v4850_v36, %s4146_s30 }
 0x326   :  { %2100 = vrot.lane.b32.xlu0 %v4850_v36, %s4147_s4  ;;  %2117 = vrot.lane.b32.xlu1 %v2088_v38, %s4148_s5 }
 0x32a   :  { %2103 = vrot.lane.b32.xlu0 %v4850_v36, %s4149_s6  ;;  %2123 = vrot.lane.b32.xlu1 %v2088_v38, %s4991_s19 }
 0x32e   :  { %2106 = vrot.lane.b32.xlu0 %v4850_v36, %s4150_s7  ;;  %2126 = vrot.lane.b32.xlu1 %v2088_v38, %s4998_s26 }
 0x332   :  { %2120 = vrot.lane.b32.xlu0 %v2088_v38, %s4138_s28  ;;  %2129 = vrot.lane.b32.xlu1 %v2088_v38, %s4151_s8 }
 0x336   :  { %2136 = vrot.lane.b32.xlu0 %v2088_v38, %s4144_s2  ;;  %2132 = vrot.lane.b32.xlu1 %v2088_v38, %s4152_s9 }
 0x33a   :  { %2112 = vrot.lane.b32.xlu0 %v2088_v38, %s4146_s30 }
 0x352   :  { %v2331_v40 = vpop.f32.mrb[18].mxu1 }
 0x353   :  { %v3935_v35 = vpop.f32.mrb[19].mxu1 }
 0x358   :  { %v2481_v29 = vpop.f32.mrb[20].mxu1 }
 0x359   :  { %v2482_v28 = vadd.f32 %v2481_v29, %v2331_v40  ;;  %v3940_v41 = vpop.f32.mrb[21].mxu1 }
 0x35c   :  { %v2645_v42 = vpop.f32.mrb[22].mxu1 }
 0x35d   :  { %v2651_v43 = vadd.f32 %v2645_v42, %v2482_v28  ;;  %v3945_v39 = vpop.f32.mrb[23].mxu1 }
 0x360   :  { %v2812_v44 = vpop.f32.mrb[24].mxu1 }
 0x361   :  { %v2818_v45 = vadd.f32 %v2812_v44, %v2651_v43  ;;  %v3950_v47 = vpop.f32.mrb[25].mxu1 }
 0x364   :  { %v2979_v48 = vpop.f32.mrb[26].mxu1 }
 0x365   :  { %v2985_v49 = vadd.f32 %v2979_v48, %v2818_v45  ;;  %v3955_v50 = vpop.f32.mrb[27].mxu1 }
 0x36a   :  { %v3146_v51 = vpop.f32.mrb[28].mxu1 }
 0x36b   :  { %v3152_v46 = vadd.f32 %v3146_v51, %v2985_v49  ;;  %v3960_v53 = vpop.f32.mrb[29].mxu1 }
 0x36e   :  { %v3313_v54 = vpop.f32.mrb[30].mxu1 }
 0x36f   :  { %v3319_v55 = vadd.f32 %v3313_v54, %v3152_v46  ;;  %v3965_v52 = vpop.f32.mrb[31].mxu1 }
 0x377   :  { %v3480_v56 = vpop.f32.mrb[32].mxu1 }
 0x378   :  { %v3486_v58 = vadd.f32 %v3480_v56, %v3319_v55  ;;  %v3970_v59 = vpop.f32.mrb[33].mxu1 }
 0x379   :  { %v2139_v1 = vpop.permute.xlu1 %2138 }
 0x37b   :  { %v3647_v60 = vpop.f32.mrb[34].mxu1 }
 0x37c   :  { %v3653_v61 = vadd.f32 %v3647_v60, %v3486_v58  ;;  %v3975_v57 = vpop.f32.mrb[35].mxu1 }
 0x37e   :  { %v4876_v63 = vadd.f32 %v3653_v61, %v4842_v30 }
 0x380   :  { %3704 = vrot.lane.b32.xlu1 %v4876_v63, %s4144_s2 }
 0x390   :  { %v2095_v3 = vpop.permute.xlu0 %2094  ;;  %v2092_v4 = vpop.permute.xlu1 %2091 }
 0x391   :  { %v2147_v21 = vsel %vm2146_vm10, %v4850_v36, %v2092_v4 }
 0x392   :  { %v2149_v25 = vsel %vm2148_vm0, %v2147_v21, %v2095_v3 }
 0x394   :  { %v3576_v0 = vpop.f32.mrb[2].mxu0  ;;  %v2098_v7 = vpop.permute.xlu0 %2097 }
 0x395   :  { %v4881_v5 = vadd.f32 %v3576_v0, %v4842_v30  ;;  %v3578_v6 = vpop.f32.mrb[3].mxu0  ;;  %v2111_v8 = vpop.permute.xlu1 %2110  ;;  %v2151_v27 = vsel %vm2150_vm3, %v2149_v25, %v2098_v7 }
 0x396   :  { %v3655_v11 = vadd.f32 %v3578_v6, %v4842_v30 }
 0x397   :  { %3661 = vrot.lane.b32.xlu0 %v4881_v5, %s4996_s24  ;;  %3658 = vrot.lane.b32.xlu1 %v4881_v5, %s4125_s0  ;;  %s4153_s0 = smov 98  }
 0x398   :  { %v2101_v9 = vpop.permute.xlu0 %2100 }
 0x399   :  { %v2118_v10 = vpop.permute.xlu1 %2117  ;;  %v2153_v2 = vsel %vm2152_vm5, %v2151_v27, %v2101_v9 }
 0x39b   :  { %3664 = vrot.lane.b32.xlu0 %v4881_v5, %s4145_s18  ;;  %3673 = vrot.lane.b32.xlu1 %v4881_v5, %s4150_s7 }
 0x39c   :  { %v2104_v12 = vpop.permute.xlu0 %2103 }
 0x39d   :  { %v2124_v14 = vpop.permute.xlu1 %2123  ;;  %v2155_v31 = vsel %vm2154_vm6, %v2153_v2, %v2104_v12 }
 0x39f   :  { %3667 = vrot.lane.b32.xlu0 %v4881_v5, %s4147_s4  ;;  %3686 = vrot.lane.b32.xlu1 %v3655_v11, %s4138_s28 }
 0x3a0   :  { %v2107_v15 = vpop.permute.xlu0 %2106 }
 0x3a1   :  { %v2127_v16 = vpop.permute.xlu1 %2126  ;;  %v2157_v34 = vsel %vm2156_vm7, %v2155_v31, %v2107_v15 }
 0x3a3   :  { %3670 = vrot.lane.b32.xlu0 %v4881_v5, %s4149_s6  ;;  %3689 = vrot.lane.b32.xlu1 %v3655_v11, %s4991_s19  ;;  %s4154_s19 = smov [#allocation3]  }
 0x3a4   :  { %v2121_v17 = vpop.permute.xlu0 %2120  ;;  %s3733_s24 = sshll.u32 %s4154_s19, 4  ;;  %s3734_s24 = int_to_ptr.vmem [resolvable:$true] %s3733_s24 }
 0x3a5   :  { %v2160_v18 = vsel %vm2146_vm10, %v2118_v10, %v2121_v17  ;;  %v2130_v13 = vpop.permute.xlu1 %2129  ;;  %p4077_p1 = scmp.lt.s32.totalorder %s3734_s24, %s3734_s24 }
 0x3a6   :  { %v2161_v22 = vsel %vm2148_vm0, %v2160_v18, %v2124_v14 }
 0x3a7   :  { %3677 = vrot.lane.b32.xlu0 %v4881_v5, %s4146_s30  ;;  %3692 = vrot.lane.b32.xlu1 %v3655_v11, %s4998_s26  ;;  %v2162_v23 = vsel %vm2150_vm3, %v2161_v22, %v2127_v16  ;;  %s4072_s26 = scalar_lea.vmem %s3734_s24, 512 }
 0x3a8   :  { %v2163_v20 = vsel %vm2152_vm5, %v2162_v23, %v2130_v13  ;;  %v2137_v24 = vpop.permute.xlu0 %2136  ;;  %p4073_p0 = scmp.ne.s32.totalorder %s3734_s24, %s4072_s26  ;;  %p4078_p2 = scmp.lt.s32.totalorder %s4072_s26, %s4072_s26 }
 0x3a9   :  { %v2141_v19 = vsel %vm2140_vm4, %v2137_v24, %v2139_v1  ;;  %v2133_v26 = vpop.permute.xlu1 %2132 }
 0x3aa   :  { %v2164_v32 = vsel %vm2154_vm6, %v2163_v20, %v2133_v26  ;;  %p4079_p3 = por %p4078_p2, %p4077_p1 }
 0x3ab   :  { %3683 = vrot.lane.b32.xlu0 %v3655_v11, %s4148_s5  ;;  %3695 = vrot.lane.b32.xlu1 %v3655_v11, %s4151_s8  ;;  %v2165_v30 = vsel %vm2156_vm7, %v2164_v32, %v2141_v19 }
 0x3ac   :  { %v2113_v33 = vpop.permute.xlu0 %2112  ;;  %p4080_p4 = pnand %p4079_p3, %p4073_p0 }
 0x3ad   :  { %v2115_v36 = vsel %vm2114_vm11, %v2111_v8, %v2113_v33 }
 0x3ae   :  { %v2159_v37 = vsel %vm2158_vm12, %v2157_v34, %v2115_v36 }
 0x3af   :  { %3702 = vrot.lane.b32.xlu0 %v3655_v11, %s4144_s2  ;;  %3698 = vrot.lane.b32.xlu1 %v3655_v11, %s4152_s9  ;;  %2167 = vst [vmem:[#allocation3] sm:$0xff] %v2159_v37 }
 0x3b3   :  { %2143 = vrot.lane.b32.xlu0 %v4845_v62, %s4153_s0  ;;  %3679 = vrot.lane.b32.xlu1 %v3655_v11, %s4146_s30 }
 0x3b7   :  { %3708 = vrot.lane.b32.xlu1 %v4876_v63, %s4153_s0 }
 0x3f2   :  { %v3705_v38 = vpop.permute.xlu1 %3704 }
 0x409   :  { %v3662_v40 = vpop.permute.xlu0 %3661  ;;  %v3659_v35 = vpop.permute.xlu1 %3658 }
 0x40a   :  { %v3711_v47 = vsel %vm2146_vm10, %v4881_v5, %v3659_v35 }
 0x40b   :  { %v3712_v50 = vsel %vm2148_vm0, %v3711_v47, %v3662_v40 }
 0x40d   :  { %v3665_v29 = vpop.permute.xlu0 %3664  ;;  %v3674_v28 = vpop.permute.xlu1 %3673 }
 0x40e   :  { %v3713_v46 = vsel %vm2150_vm3, %v3712_v50, %v3665_v29 }
 0x411   :  { %v3668_v41 = vpop.permute.xlu0 %3667  ;;  %v3687_v42 = vpop.permute.xlu1 %3686 }
 0x412   :  { %v3714_v54 = vsel %vm2152_vm5, %v3713_v46, %v3668_v41 }
 0x415   :  { %v3671_v43 = vpop.permute.xlu0 %3670  ;;  %v3690_v39 = vpop.permute.xlu1 %3689 }
 0x416   :  { %v3715_v56 = vsel %vm2154_vm6, %v3714_v54, %v3671_v43 }
 0x417   :  { %v3716_v59 = vsel %vm2156_vm7, %v3715_v56, %v3674_v28 }
 0x419   :  { %v3678_v44 = vpop.permute.xlu0 %3677  ;;  %v3693_v45 = vpop.permute.xlu1 %3692 }
 0x41d   :  { %v3684_v48 = vpop.permute.xlu0 %3683  ;;  %v3696_v62 = vpop.permute.xlu1 %3695 }
 0x41e   :  { %v3718_v49 = vsel %vm2146_vm10, %v3684_v48, %v3687_v42 }
 0x41f   :  { %v3719_v51 = vsel %vm2148_vm0, %v3718_v49, %v3690_v39 }
 0x420   :  { %v3720_v53 = vsel %vm2150_vm3, %v3719_v51, %v3693_v45 }
 0x421   :  { %v3703_v55 = vpop.permute.xlu0 %3702  ;;  %v3699_v52 = vpop.permute.xlu1 %3698  ;;  %v3721_v58 = vsel %vm2152_vm5, %v3720_v53, %v3696_v62 }
 0x422   :  { %v3706_v57 = vsel %vm2140_vm4, %v3703_v55, %v3705_v38  ;;  %v3722_v63 = vsel %vm2154_vm6, %v3721_v58, %v3699_v52 }
 0x423   :  { %v3723_v0 = vsel %vm2156_vm7, %v3722_v63, %v3706_v57 }
 0x425   :  { %v2144_v60 = vpop.permute.xlu0 %2143  ;;  %v3680_v61 = vpop.permute.xlu1 %3679 }
 0x426   :  { %v2166_v1 = vsel %vm2158_vm12, %v2165_v30, %v2144_v60  ;;  %v3681_v3 = vsel %vm2114_vm11, %v3678_v44, %v3680_v61 }
 0x427   :  { %2168 = vst [vmem:[#allocation3 + $0x8] sm:$0xff] %v2166_v1  ;;  %v3717_v4 = vsel %vm2158_vm12, %v3716_v59, %v3681_v3 }
 0x428   :  { %3726 = vst [vmem:[#allocation3 + $0x10] sm:$0xff] %v3717_v4 }
 0x429   :  { %v3709_v5 = vpop.permute.xlu1 %3708 }
 0x42a   :  { %v3724_v6 = vsel %vm2158_vm12, %v3723_v0, %v3709_v5 }
 0x42b   :  { %3727 = vst [vmem:[#allocation3 + $0x18] sm:$0xff] %v3724_v6 }
 0x42c   :  { %4083 = shalt.err (!%p4080_p4)
}
 0x42d   :  { %s4084_s15 = scalar_lea.hbm %s4958_s3, 512 }
 0x42e   :  { %p4085_p5 = scmp.ne.s32.totalorder %s4958_s3, %s4084_s15  ;;  %p4088_p6 = scmp.lt.u32.totalorder %s4084_s15, %s4958_s3 }
 0x430   :  { %p4090_p7 = pnand %p4088_p6, %p4085_p5 }
 0x432   :  { %4093 = shalt.err (!%p4090_p7)
}
 0x433   :  { %s4155_s16 = smov 256  }
 0x434   :  { %3739 = dma.vmem_to_hbm [thread:$0]  %s3734_s24, 512, %s4958_s3, [#allocation4], %s4155_s16, %s4155_s16, %s4992_s20  }
 0x435   :  { %4094 = dma.done.wait [#allocation4], 512  }
 0x436   :  { %4095 = vsyncadd [#allocation4], 4294966784 }
 0x437   :  { %3743 = vsyncpa [#allocation4], 1 }

</bundles_post_ra>
